<compile_context>
chip_gen: v7x
topology: tpu7x:2x2x1
jax: 0.10.0
libtpu: 0.0.40
codegen_flags: <defaults>
</compile_context>

<pallas_src>
import functools

import jax
import jax.numpy as jnp
from jax.experimental import pallas as pl
from jax.experimental.pallas import tpu as pltpu


def _lstm_kernel(x_ref, wih_ref, whh_ref, b_ref, wfc_ref, bfc_ref,
                 out_ref, gx_ref, h_ref, c_ref,
                 *, seq_len, chunk, needs_mask, unroll):
    """One (batch-tile, time-chunk) grid step.

    x_ref   : (Tc, Bt, I)     bf16 time-major input chunk (pipelined)
    wih_ref : (I, 4*Hp)       bf16, VMEM resident (single-buffered)
    whh_ref : (Hp, 4*Hp)      bf16, VMEM resident
    b_ref   : (1, 4*Hp)       f32  (b_ih + b_hh), gate-padded
    wfc_ref : (Hp, 6)         f32
    bfc_ref : (1, 6)          f32
    out_ref : (Bt, 6)         output block for this batch tile
    gx_ref  : (Tc, Bt, 4*Hp)  f32 scratch: x-projection (+bias) for this chunk
    h_ref/c_ref : (Bt, Hp)    f32 scratch carrying the state across time chunks
    """
    t_chunk = pl.program_id(1)
    Tc, Bt, I = x_ref.shape
    Hp = whh_ref.shape[0]

    # Reset the recurrent state at the start of each batch tile.
    @pl.when(t_chunk == 0)
    def _():
        h_ref[...] = jnp.zeros_like(h_ref)
        c_ref[...] = jnp.zeros_like(c_ref)

    # 1) Hoisted x-projection for the whole chunk: one MXU matmul (bf16 -> f32).
    xb = x_ref[...].reshape(Tc * Bt, I)
    gx = jnp.dot(xb, wih_ref[...], preferred_element_type=jnp.float32) + b_ref[...]
    gx_ref[...] = gx.reshape(Tc, Bt, 4 * Hp)

    # 2) Sequential recurrence over this chunk; h/c carried as values (vregs).
    def step(t, carry):
        h, c = carry
        gates = gx_ref[t] + jnp.dot(h.astype(jnp.bfloat16), whh_ref[...],
                                    preferred_element_type=jnp.float32)
        # Lane-aligned gate slices (Hp multiple of 128). Order: i | f | g | o.
        i_g = jax.nn.sigmoid(gates[:, 0 * Hp:1 * Hp])
        f_g = jax.nn.sigmoid(gates[:, 1 * Hp:2 * Hp])
        g_g = jnp.tanh(gates[:, 2 * Hp:3 * Hp])
        o_g = jax.nn.sigmoid(gates[:, 3 * Hp:4 * Hp])
        c_new = f_g * c + i_g * g_g
        h_new = o_g * jnp.tanh(c_new)
        if needs_mask:
            # Padded trailing time steps must not perturb the carry.
            valid = (t_chunk * chunk + t) < seq_len
            h_new = jnp.where(valid, h_new, h)
            c_new = jnp.where(valid, c_new, c)
        return h_new, c_new

    h, c = jax.lax.fori_loop(0, Tc, step, (h_ref[...], c_ref[...]),
                             unroll=unroll)
    h_ref[...] = h
    c_ref[...] = c

    # 3) Final FC on the last hidden state, once per batch tile.
    @pl.when(t_chunk == pl.num_programs(1) - 1)
    def _():
        out_ref[...] = (jnp.dot(h, wfc_ref[...],
                                preferred_element_type=jnp.float32)
                        + bfc_ref[...]).astype(out_ref.dtype)
    # TODO(synk): small-H EUP gate packing (sigmoid via tanh(x/2)) is a further
    # win when H <= 32; left out to keep the kernel simple.


def _pad_gates(w, H, Hp):
    """(K, 4H) gate-major columns -> (K, 4*Hp); gate g at columns [g*Hp, g*Hp+H)."""
    K = w.shape[0]
    w4 = w.reshape(K, 4, H)
    w4 = jnp.pad(w4, ((0, 0), (0, 0), (0, Hp - H)))
    return w4.reshape(K, 4 * Hp)


def lstm_model_forward(x, params, *, time_chunk=None, batch_tile=None):
    """x: (B, T, 3) float32 -> (B, 6) float32."""
    wih, whh, b, wfc, bfc = params        # (I,4H), (H,4H), (1,4H), (H,6), (1,6)
    B, T, I = x.shape
    H = whh.shape[0]
    Hp = ((H + 127) // 128) * 128         # lane-aligned per-gate width

    # Batch tile: keep h/c/gates comfortably inside the vreg file; 'parallel'
    # batch tiles let v7x's two TensorCores split the work.
    Bp = ((B + 7) // 8) * 8
    Bt = batch_tile if batch_tile is not None else (Bp if Bp <= 32 else 32)
    Bp = ((Bp + Bt - 1) // Bt) * Bt
    nb = Bp // Bt

    # Time chunk: bound gx scratch + double-buffered x well under v7x's 64 MiB
    # VMEM, independent of T.
    if time_chunk is None:
        budget = 20 * 2 ** 20                         # gx + pipelined x budget
        per_step = Bt * (4 * Hp * 4 + 2 * 128 * 2)    # f32 gx row + 2 bf16 x rows
        Tc = int(max(1, min(T, budget // per_step, 256)))
    else:
        Tc = time_chunk
    nt = (T + Tc - 1) // Tc
    Tp = nt * Tc
    needs_mask = (Tp != T)

    # Weight layout: per-gate blocks padded to Hp lanes (zero padding keeps real
    # lanes bit-identical). MXU operands in bf16; bias / FC / state in f32.
    wih_p = _pad_gates(wih, H, Hp).astype(jnp.bfloat16)                  # (I, 4Hp)
    whh_p = jnp.zeros((Hp, 4 * Hp), jnp.float32).at[:H].set(
        _pad_gates(whh, H, Hp)).astype(jnp.bfloat16)                     # (Hp, 4Hp)
    b_p = _pad_gates(b, H, Hp)                                           # (1, 4Hp)
    wfc_p = jnp.zeros((Hp, 6), jnp.float32).at[:H].set(wfc)              # (Hp, 6)
    bfc_p = bfc                                                          # (1, 6)

    # (B,T,I) -> time-major (Tp, Bp, I), zero-padded, bf16 matmul operand.
    x_tbi = jnp.transpose(x, (1, 0, 2))
    x_tbi = jnp.pad(x_tbi, ((0, Tp - T), (0, Bp - B), (0, 0)))
    x_tbi = x_tbi.astype(jnp.bfloat16)

    # Explicit VMEM limit computed from (lane/sublane padded) buffer sizes.
    f32, bf16 = 4, 2
    vmem_bytes = (
        2 * Tc * Bt * 128 * bf16            # x, double-buffered (3 -> 128 lanes)
        + Tc * Bt * 4 * Hp * f32            # gx scratch
        + 8 * 4 * Hp * bf16                 # wih (3 -> 8 sublanes)
        + Hp * 4 * Hp * bf16                # whh
        + 8 * 4 * Hp * f32                  # bias
        + Hp * 128 * f32 + 8 * 128 * f32    # wfc, bfc (6 -> 128 lanes)
        + 2 * Bt * Hp * f32                 # h, c carry scratch
        + 2 * Bt * 128 * f32                # output block
    )
    vmem_limit = int(min(64 * 2 ** 20, max(32 * 2 ** 20, 2 * vmem_bytes)))

    kernel = functools.partial(_lstm_kernel, seq_len=T, chunk=Tc,
                               needs_mask=needs_mask, unroll=min(Tc, 8))

    out = pl.pallas_call(
        kernel,
        out_shape=jax.ShapeDtypeStruct((Bp, 6), jnp.float32),
        grid_spec=pltpu.PrefetchScalarGridSpec(
            num_scalar_prefetch=0,
            grid=(nb, nt),
            in_specs=[
                # x: pipelined per (batch tile, time chunk).
                pl.BlockSpec((Tc, Bt, I), lambda bi, ti: (ti, bi, 0)),
                # Loop-invariant weights/biases: whole-array VMEM residents
                # (single-buffered, no per-step re-DMA).
                pl.BlockSpec(memory_space=pltpu.MemorySpace.VMEM),
                pl.BlockSpec(memory_space=pltpu.MemorySpace.VMEM),
                pl.BlockSpec(memory_space=pltpu.MemorySpace.VMEM),
                pl.BlockSpec(memory_space=pltpu.MemorySpace.VMEM),
                pl.BlockSpec(memory_space=pltpu.MemorySpace.VMEM),
            ],
            out_specs=pl.BlockSpec((Bt, 6), lambda bi, ti: (bi, 0)),
            scratch_shapes=[
                pltpu.VMEM((Tc, Bt, 4 * Hp), jnp.float32),   # gx (chunk-local)
                pltpu.VMEM((Bt, Hp), jnp.float32),           # h carry
                pltpu.VMEM((Bt, Hp), jnp.float32),           # c carry
            ],
        ),
        compiler_params=pltpu.CompilerParams(
            dimension_semantics=("parallel", "arbitrary"),
            vmem_limit_bytes=vmem_limit),
    )(x_tbi, wih_p, whh_p, b_p, wfc_p, bfc_p)

    return out[:B]


def init_params(key, n_hidden, n_input=3, n_out=6):
    """Deterministic init mirroring PyTorch shapes; weights stored transposed
    so the math is x @ W directly. Gate order: i | f | g | o."""
    H = n_hidden
    k = 1.0 / jnp.sqrt(jnp.float32(H))
    keys = jax.random.split(key, 6)
    w_ih = jax.random.uniform(keys[0], (4 * H, n_input), jnp.float32, -k, k)
    w_hh = jax.random.uniform(keys[1], (4 * H, H), jnp.float32, -k, k)
    b_ih = jax.random.uniform(keys[2], (4 * H,), jnp.float32, -k, k)
    b_hh = jax.random.uniform(keys[3], (4 * H,), jnp.float32, -k, k)
    w_fc = jax.random.uniform(keys[4], (n_out, H), jnp.float32, -k, k)
    b_fc = jax.random.uniform(keys[5], (n_out,), jnp.float32, -k, k)
    return (
        w_ih.T,                         # (I, 4H)
        w_hh.T,                         # (H, 4H)
        (b_ih + b_hh)[None, :],         # (1, 4H)
        w_fc.T,                         # (H, 6)
        b_fc[None, :],                  # (1, 6)
    )


def reference_forward(x, params):
    """Pure-JAX f32 reference of the same forward pass (lax.scan over time)."""
    wih, whh, b, wfc, bfc = params
    B = x.shape[0]
    H = whh.shape[0]

    def step(carry, x_t):
        h, c = carry
        gates = x_t @ wih + h @ whh + b
        i_g = jax.nn.sigmoid(gates[:, 0:H])
        f_g = jax.nn.sigmoid(gates[:, H:2 * H])
        g_g = jnp.tanh(gates[:, 2 * H:3 * H])
        o_g = jax.nn.sigmoid(gates[:, 3 * H:4 * H])
        c = f_g * c + i_g * g_g
        h = o_g * jnp.tanh(c)
        return (h, c), None

    h0 = jnp.zeros((B, H), jnp.float32)
    c0 = jnp.zeros((B, H), jnp.float32)
    (h, _), _ = jax.lax.scan(step, (h0, c0), jnp.transpose(x, (1, 0, 2)))
    return h @ wfc + bfc


if __name__ == "__main__":
    B, T, I, H = 2, 8, 3, 32
    key = jax.random.PRNGKey(0)
    kx, kp = jax.random.split(key)
    x = jax.random.normal(kx, (B, T, I), jnp.float32)
    params = init_params(kp, H, I, 6)

    out = jax.block_until_ready(lstm_model_forward(x, params))
    ref = reference_forward(x, params)

    assert out.shape == (B, 6)
    # bf16 MXU operands (f32 accumulation / state) -> loosened tolerance vs f32 ref.
    assert jnp.allclose(out, ref, atol=2e-2, rtol=2e-2), (out, ref)
    print("KERNEL_OK")
</pallas_src>

<mosaic_0001>
module attributes {stable_mosaic.version = 11 : i64} {
  func.func @_lstm_kernel(%arg0: i32, %arg1: i32, %arg2: memref<8x8x3xbf16, #tpu.memory_space<vmem>>, %arg3: memref<3x512xbf16, #tpu.memory_space<vmem>>, %arg4: memref<128x512xbf16, #tpu.memory_space<vmem>>, %arg5: memref<1x512xf32, #tpu.memory_space<vmem>>, %arg6: memref<128x6xf32, #tpu.memory_space<vmem>>, %arg7: memref<1x6xf32, #tpu.memory_space<vmem>>, %arg8: memref<8x6xf32, #tpu.memory_space<vmem>>, %arg9: memref<8x8x512xf32, #tpu.memory_space<vmem>>, %arg10: memref<8x128xf32, #tpu.memory_space<vmem>>, %arg11: memref<8x128xf32, #tpu.memory_space<vmem>>) attributes {dimension_semantics = [#tpu.dimension_semantics<parallel>, #tpu.dimension_semantics<arbitrary>], iteration_bounds = array<i64: 1, 1>, scalar_prefetch = 0 : i64, scratch_operands = 3 : i64, tpu.core_type = #tpu.core_type<tc>, window_params = [{transform_indices = @transform_0, window_bounds = array<i64: 8, 8, 3>}, {pipeline_mode = #tpu.pipeline_mode<synchronous>, transform_indices = @transform_1, window_bounds = array<i64: 3, 512>}, {pipeline_mode = #tpu.pipeline_mode<synchronous>, transform_indices = @transform_2, window_bounds = array<i64: 128, 512>}, {pipeline_mode = #tpu.pipeline_mode<synchronous>, transform_indices = @transform_3, window_bounds = array<i64: 1, 512>}, {pipeline_mode = #tpu.pipeline_mode<synchronous>, transform_indices = @transform_4, window_bounds = array<i64: 128, 6>}, {pipeline_mode = #tpu.pipeline_mode<synchronous>, transform_indices = @transform_5, window_bounds = array<i64: 1, 6>}, {transform_indices = @transform_6, window_bounds = array<i64: 8, 6>}]} {
    %c0_i32 = arith.constant 0 : i32
    %0 = arith.cmpi eq, %arg1, %c0_i32 : i32
    %1 = arith.extui %0 : i1 to i32
    %c0_i32_0 = arith.constant 0 : i32
    %2 = arith.cmpi ne, %1, %c0_i32_0 : i32
    scf.if %2 {
      %cst_85 = arith.constant 0.000000e+00 : f32
      %275 = vector.broadcast %cst_85 : f32 to vector<8x128xf32>
      %c0_86 = arith.constant 0 : index
      %c0_87 = arith.constant 0 : index
      %276 = vector.load %arg10[%c0_86, %c0_87] : memref<8x128xf32, #tpu.memory_space<vmem>>, vector<8x128xf32>
      tpu.vector_store %arg10[%c0_86, %c0_87], %275 {strides = array<i32>} : memref<8x128xf32, #tpu.memory_space<vmem>>, vector<8x128xf32>,
      %cst_88 = arith.constant 0.000000e+00 : f32
      %277 = vector.broadcast %cst_88 : f32 to vector<8x128xf32>
      %c0_89 = arith.constant 0 : index
      %c0_90 = arith.constant 0 : index
      %278 = vector.load %arg11[%c0_89, %c0_90] : memref<8x128xf32, #tpu.memory_space<vmem>>, vector<8x128xf32>
      tpu.vector_store %arg11[%c0_89, %c0_90], %277 {strides = array<i32>} : memref<8x128xf32, #tpu.memory_space<vmem>>, vector<8x128xf32>,
    } else {
    }
    %c0 = arith.constant 0 : index
    %c0_1 = arith.constant 0 : index
    %c0_2 = arith.constant 0 : index
    %3 = vector.load %arg2[%c0, %c0_1, %c0_2] : memref<8x8x3xbf16, #tpu.memory_space<vmem>>, vector<8x8x3xbf16>
    %4 = vector.shape_cast %3 : vector<8x8x3xbf16> to vector<64x3xbf16>
    %c0_3 = arith.constant 0 : index
    %c0_4 = arith.constant 0 : index
    %5 = vector.load %arg3[%c0_3, %c0_4] : memref<3x512xbf16, #tpu.memory_space<vmem>>, vector<3x512xbf16>
    %cst = arith.constant dense<0.000000e+00> : vector<64x512xf32>
    %6 = tpu.matmul %4, %5, %cst {dimension_numbers = #tpu.dot_dimension_numbers<[1], [0], [0], [1], [0, 0, 1, 1], [], []>} : vector<64x3xbf16>, vector<3x512xbf16>, vector<64x512xf32> -> vector<64x512xf32>
    %c0_5 = arith.constant 0 : index
    %c0_6 = arith.constant 0 : index
    %7 = vector.load %arg5[%c0_5, %c0_6] : memref<1x512xf32, #tpu.memory_space<vmem>>, vector<1x512xf32>
    %8 = vector.broadcast %7 : vector<1x512xf32> to vector<64x512xf32>
    %9 = arith.addf %6, %8 : vector<64x512xf32>
    %10 = vector.shape_cast %9 : vector<64x512xf32> to vector<8x8x512xf32>
    %c0_7 = arith.constant 0 : index
    %c0_8 = arith.constant 0 : index
    %c0_9 = arith.constant 0 : index
    %11 = vector.load %arg9[%c0_7, %c0_8, %c0_9] : memref<8x8x512xf32, #tpu.memory_space<vmem>>, vector<8x8x512xf32>
    tpu.vector_store %arg9[%c0_7, %c0_8, %c0_9], %10 {strides = array<i32>} : memref<8x8x512xf32, #tpu.memory_space<vmem>>, vector<8x8x512xf32>,
    %c0_10 = arith.constant 0 : index
    %c0_11 = arith.constant 0 : index
    %12 = vector.load %arg10[%c0_10, %c0_11] : memref<8x128xf32, #tpu.memory_space<vmem>>, vector<8x128xf32>
    %c0_12 = arith.constant 0 : index
    %c0_13 = arith.constant 0 : index
    %13 = vector.load %arg11[%c0_12, %c0_13] : memref<8x128xf32, #tpu.memory_space<vmem>>, vector<8x128xf32>
    %c0_i32_14 = arith.constant 0 : i32
    %14 = arith.index_cast %c0_i32_14 : i32 to index
    %c0_15 = arith.constant 0 : index
    %c0_16 = arith.constant 0 : index
    %15 = vector.load %arg9[%14, %c0_15, %c0_16] : memref<8x8x512xf32, #tpu.memory_space<vmem>>, vector<1x8x512xf32>
    %16 = vector.shape_cast %15 : vector<1x8x512xf32> to vector<8x512xf32>
    %17 = arith.truncf %12 : vector<8x128xf32> to vector<8x128xbf16>
    %c0_17 = arith.constant 0 : index
    %c0_18 = arith.constant 0 : index
    %18 = vector.load %arg4[%c0_17, %c0_18] : memref<128x512xbf16, #tpu.memory_space<vmem>>, vector<128x512xbf16>
    %cst_19 = arith.constant dense<0.000000e+00> : vector<8x512xf32>
    %19 = tpu.matmul %17, %18, %cst_19 {dimension_numbers = #tpu.dot_dimension_numbers<[1], [0], [0], [1], [0, 0, 1, 1], [], []>} : vector<8x128xbf16>, vector<128x512xbf16>, vector<8x512xf32> -> vector<8x512xf32>
    %20 = arith.addf %16, %19 : vector<8x512xf32>
    %21 = vector.extract_strided_slice %20 {offsets = [0, 0], sizes = [8, 128], strides = [1, 1]} : vector<8x512xf32> to vector<8x128xf32>
    %22 = arith.negf %21 : vector<8x128xf32>
    %23 = math.exp %22 : vector<8x128xf32>
    %cst_20 = arith.constant 1.000000e+00 : f32
    %24 = vector.broadcast %cst_20 : f32 to vector<8x128xf32>
    %25 = arith.addf %24, %23 : vector<8x128xf32>
    %26 = arith.divf %24, %25 : vector<8x128xf32>
    %27 = vector.extract_strided_slice %20 {offsets = [0, 128], sizes = [8, 128], strides = [1, 1]} : vector<8x512xf32> to vector<8x128xf32>
    %28 = arith.negf %27 : vector<8x128xf32>
    %29 = math.exp %28 : vector<8x128xf32>
    %cst_21 = arith.constant 1.000000e+00 : f32
    %30 = vector.broadcast %cst_21 : f32 to vector<8x128xf32>
    %31 = arith.addf %30, %29 : vector<8x128xf32>
    %32 = arith.divf %30, %31 : vector<8x128xf32>
    %33 = vector.extract_strided_slice %20 {offsets = [0, 256], sizes = [8, 128], strides = [1, 1]} : vector<8x512xf32> to vector<8x128xf32>
    %34 = math.tanh %33 : vector<8x128xf32>
    %35 = vector.extract_strided_slice %20 {offsets = [0, 384], sizes = [8, 128], strides = [1, 1]} : vector<8x512xf32> to vector<8x128xf32>
    %36 = arith.negf %35 : vector<8x128xf32>
    %37 = math.exp %36 : vector<8x128xf32>
    %cst_22 = arith.constant 1.000000e+00 : f32
    %38 = vector.broadcast %cst_22 : f32 to vector<8x128xf32>
    %39 = arith.addf %38, %37 : vector<8x128xf32>
    %40 = arith.divf %38, %39 : vector<8x128xf32>
    %41 = arith.mulf %32, %13 : vector<8x128xf32>
    %42 = arith.mulf %26, %34 : vector<8x128xf32>
    %43 = arith.addf %41, %42 : vector<8x128xf32>
    %44 = math.tanh %43 : vector<8x128xf32>
    %45 = arith.mulf %40, %44 : vector<8x128xf32>
    %c1_i32 = arith.constant 1 : i32
    %46 = arith.index_cast %c1_i32 : i32 to index
    %c0_23 = arith.constant 0 : index
    %c0_24 = arith.constant 0 : index
    %47 = vector.load %arg9[%46, %c0_23, %c0_24] : memref<8x8x512xf32, #tpu.memory_space<vmem>>, vector<1x8x512xf32>
    %48 = vector.shape_cast %47 : vector<1x8x512xf32> to vector<8x512xf32>
    %49 = arith.truncf %45 : vector<8x128xf32> to vector<8x128xbf16>
    %c0_25 = arith.constant 0 : index
    %c0_26 = arith.constant 0 : index
    %50 = vector.load %arg4[%c0_25, %c0_26] : memref<128x512xbf16, #tpu.memory_space<vmem>>, vector<128x512xbf16>
    %cst_27 = arith.constant dense<0.000000e+00> : vector<8x512xf32>
    %51 = tpu.matmul %49, %50, %cst_27 {dimension_numbers = #tpu.dot_dimension_numbers<[1], [0], [0], [1], [0, 0, 1, 1], [], []>} : vector<8x128xbf16>, vector<128x512xbf16>, vector<8x512xf32> -> vector<8x512xf32>
    %52 = arith.addf %48, %51 : vector<8x512xf32>
    %53 = vector.extract_strided_slice %52 {offsets = [0, 0], sizes = [8, 128], strides = [1, 1]} : vector<8x512xf32> to vector<8x128xf32>
    %54 = arith.negf %53 : vector<8x128xf32>
    %55 = math.exp %54 : vector<8x128xf32>
    %cst_28 = arith.constant 1.000000e+00 : f32
    %56 = vector.broadcast %cst_28 : f32 to vector<8x128xf32>
    %57 = arith.addf %56, %55 : vector<8x128xf32>
    %58 = arith.divf %56, %57 : vector<8x128xf32>
    %59 = vector.extract_strided_slice %52 {offsets = [0, 128], sizes = [8, 128], strides = [1, 1]} : vector<8x512xf32> to vector<8x128xf32>
    %60 = arith.negf %59 : vector<8x128xf32>
    %61 = math.exp %60 : vector<8x128xf32>
    %cst_29 = arith.constant 1.000000e+00 : f32
    %62 = vector.broadcast %cst_29 : f32 to vector<8x128xf32>
    %63 = arith.addf %62, %61 : vector<8x128xf32>
    %64 = arith.divf %62, %63 : vector<8x128xf32>
    %65 = vector.extract_strided_slice %52 {offsets = [0, 256], sizes = [8, 128], strides = [1, 1]} : vector<8x512xf32> to vector<8x128xf32>
    %66 = math.tanh %65 : vector<8x128xf32>
    %67 = vector.extract_strided_slice %52 {offsets = [0, 384], sizes = [8, 128], strides = [1, 1]} : vector<8x512xf32> to vector<8x128xf32>
    %68 = arith.negf %67 : vector<8x128xf32>
    %69 = math.exp %68 : vector<8x128xf32>
    %cst_30 = arith.constant 1.000000e+00 : f32
    %70 = vector.broadcast %cst_30 : f32 to vector<8x128xf32>
    %71 = arith.addf %70, %69 : vector<8x128xf32>
    %72 = arith.divf %70, %71 : vector<8x128xf32>
    %73 = arith.mulf %64, %43 : vector<8x128xf32>
    %74 = arith.mulf %58, %66 : vector<8x128xf32>
    %75 = arith.addf %73, %74 : vector<8x128xf32>
    %76 = math.tanh %75 : vector<8x128xf32>
    %77 = arith.mulf %72, %76 : vector<8x128xf32>
    %c2_i32 = arith.constant 2 : i32
    %78 = arith.index_cast %c2_i32 : i32 to index
    %c0_31 = arith.constant 0 : index
    %c0_32 = arith.constant 0 : index
    %79 = vector.load %arg9[%78, %c0_31, %c0_32] : memref<8x8x512xf32, #tpu.memory_space<vmem>>, vector<1x8x512xf32>
    %80 = vector.shape_cast %79 : vector<1x8x512xf32> to vector<8x512xf32>
    %81 = arith.truncf %77 : vector<8x128xf32> to vector<8x128xbf16>
    %c0_33 = arith.constant 0 : index
    %c0_34 = arith.constant 0 : index
    %82 = vector.load %arg4[%c0_33, %c0_34] : memref<128x512xbf16, #tpu.memory_space<vmem>>, vector<128x512xbf16>
    %cst_35 = arith.constant dense<0.000000e+00> : vector<8x512xf32>
    %83 = tpu.matmul %81, %82, %cst_35 {dimension_numbers = #tpu.dot_dimension_numbers<[1], [0], [0], [1], [0, 0, 1, 1], [], []>} : vector<8x128xbf16>, vector<128x512xbf16>, vector<8x512xf32> -> vector<8x512xf32>
    %84 = arith.addf %80, %83 : vector<8x512xf32>
    %85 = vector.extract_strided_slice %84 {offsets = [0, 0], sizes = [8, 128], strides = [1, 1]} : vector<8x512xf32> to vector<8x128xf32>
    %86 = arith.negf %85 : vector<8x128xf32>
    %87 = math.exp %86 : vector<8x128xf32>
    %cst_36 = arith.constant 1.000000e+00 : f32
    %88 = vector.broadcast %cst_36 : f32 to vector<8x128xf32>
    %89 = arith.addf %88, %87 : vector<8x128xf32>
    %90 = arith.divf %88, %89 : vector<8x128xf32>
    %91 = vector.extract_strided_slice %84 {offsets = [0, 128], sizes = [8, 128], strides = [1, 1]} : vector<8x512xf32> to vector<8x128xf32>
    %92 = arith.negf %91 : vector<8x128xf32>
    %93 = math.exp %92 : vector<8x128xf32>
    %cst_37 = arith.constant 1.000000e+00 : f32
    %94 = vector.broadcast %cst_37 : f32 to vector<8x128xf32>
    %95 = arith.addf %94, %93 : vector<8x128xf32>
    %96 = arith.divf %94, %95 : vector<8x128xf32>
    %97 = vector.extract_strided_slice %84 {offsets = [0, 256], sizes = [8, 128], strides = [1, 1]} : vector<8x512xf32> to vector<8x128xf32>
    %98 = math.tanh %97 : vector<8x128xf32>
    %99 = vector.extract_strided_slice %84 {offsets = [0, 384], sizes = [8, 128], strides = [1, 1]} : vector<8x512xf32> to vector<8x128xf32>
    %100 = arith.negf %99 : vector<8x128xf32>
    %101 = math.exp %100 : vector<8x128xf32>
    %cst_38 = arith.constant 1.000000e+00 : f32
    %102 = vector.broadcast %cst_38 : f32 to vector<8x128xf32>
    %103 = arith.addf %102, %101 : vector<8x128xf32>
    %104 = arith.divf %102, %103 : vector<8x128xf32>
    %105 = arith.mulf %96, %75 : vector<8x128xf32>
    %106 = arith.mulf %90, %98 : vector<8x128xf32>
    %107 = arith.addf %105, %106 : vector<8x128xf32>
    %108 = math.tanh %107 : vector<8x128xf32>
    %109 = arith.mulf %104, %108 : vector<8x128xf32>
    %c3_i32 = arith.constant 3 : i32
    %110 = arith.index_cast %c3_i32 : i32 to index
    %c0_39 = arith.constant 0 : index
    %c0_40 = arith.constant 0 : index
    %111 = vector.load %arg9[%110, %c0_39, %c0_40] : memref<8x8x512xf32, #tpu.memory_space<vmem>>, vector<1x8x512xf32>
    %112 = vector.shape_cast %111 : vector<1x8x512xf32> to vector<8x512xf32>
    %113 = arith.truncf %109 : vector<8x128xf32> to vector<8x128xbf16>
    %c0_41 = arith.constant 0 : index
    %c0_42 = arith.constant 0 : index
    %114 = vector.load %arg4[%c0_41, %c0_42] : memref<128x512xbf16, #tpu.memory_space<vmem>>, vector<128x512xbf16>
    %cst_43 = arith.constant dense<0.000000e+00> : vector<8x512xf32>
    %115 = tpu.matmul %113, %114, %cst_43 {dimension_numbers = #tpu.dot_dimension_numbers<[1], [0], [0], [1], [0, 0, 1, 1], [], []>} : vector<8x128xbf16>, vector<128x512xbf16>, vector<8x512xf32> -> vector<8x512xf32>
    %116 = arith.addf %112, %115 : vector<8x512xf32>
    %117 = vector.extract_strided_slice %116 {offsets = [0, 0], sizes = [8, 128], strides = [1, 1]} : vector<8x512xf32> to vector<8x128xf32>
    %118 = arith.negf %117 : vector<8x128xf32>
    %119 = math.exp %118 : vector<8x128xf32>
    %cst_44 = arith.constant 1.000000e+00 : f32
    %120 = vector.broadcast %cst_44 : f32 to vector<8x128xf32>
    %121 = arith.addf %120, %119 : vector<8x128xf32>
    %122 = arith.divf %120, %121 : vector<8x128xf32>
    %123 = vector.extract_strided_slice %116 {offsets = [0, 128], sizes = [8, 128], strides = [1, 1]} : vector<8x512xf32> to vector<8x128xf32>
    %124 = arith.negf %123 : vector<8x128xf32>
    %125 = math.exp %124 : vector<8x128xf32>
    %cst_45 = arith.constant 1.000000e+00 : f32
    %126 = vector.broadcast %cst_45 : f32 to vector<8x128xf32>
    %127 = arith.addf %126, %125 : vector<8x128xf32>
    %128 = arith.divf %126, %127 : vector<8x128xf32>
    %129 = vector.extract_strided_slice %116 {offsets = [0, 256], sizes = [8, 128], strides = [1, 1]} : vector<8x512xf32> to vector<8x128xf32>
    %130 = math.tanh %129 : vector<8x128xf32>
    %131 = vector.extract_strided_slice %116 {offsets = [0, 384], sizes = [8, 128], strides = [1, 1]} : vector<8x512xf32> to vector<8x128xf32>
    %132 = arith.negf %131 : vector<8x128xf32>
    %133 = math.exp %132 : vector<8x128xf32>
    %cst_46 = arith.constant 1.000000e+00 : f32
    %134 = vector.broadcast %cst_46 : f32 to vector<8x128xf32>
    %135 = arith.addf %134, %133 : vector<8x128xf32>
    %136 = arith.divf %134, %135 : vector<8x128xf32>
    %137 = arith.mulf %128, %107 : vector<8x128xf32>
    %138 = arith.mulf %122, %130 : vector<8x128xf32>
    %139 = arith.addf %137, %138 : vector<8x128xf32>
    %140 = math.tanh %139 : vector<8x128xf32>
    %141 = arith.mulf %136, %140 : vector<8x128xf32>
    %c4_i32 = arith.constant 4 : i32
    %142 = arith.index_cast %c4_i32 : i32 to index
    %c0_47 = arith.constant 0 : index
    %c0_48 = arith.constant 0 : index
    %143 = vector.load %arg9[%142, %c0_47, %c0_48] : memref<8x8x512xf32, #tpu.memory_space<vmem>>, vector<1x8x512xf32>
    %144 = vector.shape_cast %143 : vector<1x8x512xf32> to vector<8x512xf32>
    %145 = arith.truncf %141 : vector<8x128xf32> to vector<8x128xbf16>
    %c0_49 = arith.constant 0 : index
    %c0_50 = arith.constant 0 : index
    %146 = vector.load %arg4[%c0_49, %c0_50] : memref<128x512xbf16, #tpu.memory_space<vmem>>, vector<128x512xbf16>
    %cst_51 = arith.constant dense<0.000000e+00> : vector<8x512xf32>
    %147 = tpu.matmul %145, %146, %cst_51 {dimension_numbers = #tpu.dot_dimension_numbers<[1], [0], [0], [1], [0, 0, 1, 1], [], []>} : vector<8x128xbf16>, vector<128x512xbf16>, vector<8x512xf32> -> vector<8x512xf32>
    %148 = arith.addf %144, %147 : vector<8x512xf32>
    %149 = vector.extract_strided_slice %148 {offsets = [0, 0], sizes = [8, 128], strides = [1, 1]} : vector<8x512xf32> to vector<8x128xf32>
    %150 = arith.negf %149 : vector<8x128xf32>
    %151 = math.exp %150 : vector<8x128xf32>
    %cst_52 = arith.constant 1.000000e+00 : f32
    %152 = vector.broadcast %cst_52 : f32 to vector<8x128xf32>
    %153 = arith.addf %152, %151 : vector<8x128xf32>
    %154 = arith.divf %152, %153 : vector<8x128xf32>
    %155 = vector.extract_strided_slice %148 {offsets = [0, 128], sizes = [8, 128], strides = [1, 1]} : vector<8x512xf32> to vector<8x128xf32>
    %156 = arith.negf %155 : vector<8x128xf32>
    %157 = math.exp %156 : vector<8x128xf32>
    %cst_53 = arith.constant 1.000000e+00 : f32
    %158 = vector.broadcast %cst_53 : f32 to vector<8x128xf32>
    %159 = arith.addf %158, %157 : vector<8x128xf32>
    %160 = arith.divf %158, %159 : vector<8x128xf32>
    %161 = vector.extract_strided_slice %148 {offsets = [0, 256], sizes = [8, 128], strides = [1, 1]} : vector<8x512xf32> to vector<8x128xf32>
    %162 = math.tanh %161 : vector<8x128xf32>
    %163 = vector.extract_strided_slice %148 {offsets = [0, 384], sizes = [8, 128], strides = [1, 1]} : vector<8x512xf32> to vector<8x128xf32>
    %164 = arith.negf %163 : vector<8x128xf32>
    %165 = math.exp %164 : vector<8x128xf32>
    %cst_54 = arith.constant 1.000000e+00 : f32
    %166 = vector.broadcast %cst_54 : f32 to vector<8x128xf32>
    %167 = arith.addf %166, %165 : vector<8x128xf32>
    %168 = arith.divf %166, %167 : vector<8x128xf32>
    %169 = arith.mulf %160, %139 : vector<8x128xf32>
    %170 = arith.mulf %154, %162 : vector<8x128xf32>
    %171 = arith.addf %169, %170 : vector<8x128xf32>
    %172 = math.tanh %171 : vector<8x128xf32>
    %173 = arith.mulf %168, %172 : vector<8x128xf32>
    %c5_i32 = arith.constant 5 : i32
    %174 = arith.index_cast %c5_i32 : i32 to index
    %c0_55 = arith.constant 0 : index
    %c0_56 = arith.constant 0 : index
    %175 = vector.load %arg9[%174, %c0_55, %c0_56] : memref<8x8x512xf32, #tpu.memory_space<vmem>>, vector<1x8x512xf32>
    %176 = vector.shape_cast %175 : vector<1x8x512xf32> to vector<8x512xf32>
    %177 = arith.truncf %173 : vector<8x128xf32> to vector<8x128xbf16>
    %c0_57 = arith.constant 0 : index
    %c0_58 = arith.constant 0 : index
    %178 = vector.load %arg4[%c0_57, %c0_58] : memref<128x512xbf16, #tpu.memory_space<vmem>>, vector<128x512xbf16>
    %cst_59 = arith.constant dense<0.000000e+00> : vector<8x512xf32>
    %179 = tpu.matmul %177, %178, %cst_59 {dimension_numbers = #tpu.dot_dimension_numbers<[1], [0], [0], [1], [0, 0, 1, 1], [], []>} : vector<8x128xbf16>, vector<128x512xbf16>, vector<8x512xf32> -> vector<8x512xf32>
    %180 = arith.addf %176, %179 : vector<8x512xf32>
    %181 = vector.extract_strided_slice %180 {offsets = [0, 0], sizes = [8, 128], strides = [1, 1]} : vector<8x512xf32> to vector<8x128xf32>
    %182 = arith.negf %181 : vector<8x128xf32>
    %183 = math.exp %182 : vector<8x128xf32>
    %cst_60 = arith.constant 1.000000e+00 : f32
    %184 = vector.broadcast %cst_60 : f32 to vector<8x128xf32>
    %185 = arith.addf %184, %183 : vector<8x128xf32>
    %186 = arith.divf %184, %185 : vector<8x128xf32>
    %187 = vector.extract_strided_slice %180 {offsets = [0, 128], sizes = [8, 128], strides = [1, 1]} : vector<8x512xf32> to vector<8x128xf32>
    %188 = arith.negf %187 : vector<8x128xf32>
    %189 = math.exp %188 : vector<8x128xf32>
    %cst_61 = arith.constant 1.000000e+00 : f32
    %190 = vector.broadcast %cst_61 : f32 to vector<8x128xf32>
    %191 = arith.addf %190, %189 : vector<8x128xf32>
    %192 = arith.divf %190, %191 : vector<8x128xf32>
    %193 = vector.extract_strided_slice %180 {offsets = [0, 256], sizes = [8, 128], strides = [1, 1]} : vector<8x512xf32> to vector<8x128xf32>
    %194 = math.tanh %193 : vector<8x128xf32>
    %195 = vector.extract_strided_slice %180 {offsets = [0, 384], sizes = [8, 128], strides = [1, 1]} : vector<8x512xf32> to vector<8x128xf32>
    %196 = arith.negf %195 : vector<8x128xf32>
    %197 = math.exp %196 : vector<8x128xf32>
    %cst_62 = arith.constant 1.000000e+00 : f32
    %198 = vector.broadcast %cst_62 : f32 to vector<8x128xf32>
    %199 = arith.addf %198, %197 : vector<8x128xf32>
    %200 = arith.divf %198, %199 : vector<8x128xf32>
    %201 = arith.mulf %192, %171 : vector<8x128xf32>
    %202 = arith.mulf %186, %194 : vector<8x128xf32>
    %203 = arith.addf %201, %202 : vector<8x128xf32>
    %204 = math.tanh %203 : vector<8x128xf32>
    %205 = arith.mulf %200, %204 : vector<8x128xf32>
    %c6_i32 = arith.constant 6 : i32
    %206 = arith.index_cast %c6_i32 : i32 to index
    %c0_63 = arith.constant 0 : index
    %c0_64 = arith.constant 0 : index
    %207 = vector.load %arg9[%206, %c0_63, %c0_64] : memref<8x8x512xf32, #tpu.memory_space<vmem>>, vector<1x8x512xf32>
    %208 = vector.shape_cast %207 : vector<1x8x512xf32> to vector<8x512xf32>
    %209 = arith.truncf %205 : vector<8x128xf32> to vector<8x128xbf16>
    %c0_65 = arith.constant 0 : index
    %c0_66 = arith.constant 0 : index
    %210 = vector.load %arg4[%c0_65, %c0_66] : memref<128x512xbf16, #tpu.memory_space<vmem>>, vector<128x512xbf16>
    %cst_67 = arith.constant dense<0.000000e+00> : vector<8x512xf32>
    %211 = tpu.matmul %209, %210, %cst_67 {dimension_numbers = #tpu.dot_dimension_numbers<[1], [0], [0], [1], [0, 0, 1, 1], [], []>} : vector<8x128xbf16>, vector<128x512xbf16>, vector<8x512xf32> -> vector<8x512xf32>
    %212 = arith.addf %208, %211 : vector<8x512xf32>
    %213 = vector.extract_strided_slice %212 {offsets = [0, 0], sizes = [8, 128], strides = [1, 1]} : vector<8x512xf32> to vector<8x128xf32>
    %214 = arith.negf %213 : vector<8x128xf32>
    %215 = math.exp %214 : vector<8x128xf32>
    %cst_68 = arith.constant 1.000000e+00 : f32
    %216 = vector.broadcast %cst_68 : f32 to vector<8x128xf32>
    %217 = arith.addf %216, %215 : vector<8x128xf32>
    %218 = arith.divf %216, %217 : vector<8x128xf32>
    %219 = vector.extract_strided_slice %212 {offsets = [0, 128], sizes = [8, 128], strides = [1, 1]} : vector<8x512xf32> to vector<8x128xf32>
    %220 = arith.negf %219 : vector<8x128xf32>
    %221 = math.exp %220 : vector<8x128xf32>
    %cst_69 = arith.constant 1.000000e+00 : f32
    %222 = vector.broadcast %cst_69 : f32 to vector<8x128xf32>
    %223 = arith.addf %222, %221 : vector<8x128xf32>
    %224 = arith.divf %222, %223 : vector<8x128xf32>
    %225 = vector.extract_strided_slice %212 {offsets = [0, 256], sizes = [8, 128], strides = [1, 1]} : vector<8x512xf32> to vector<8x128xf32>
    %226 = math.tanh %225 : vector<8x128xf32>
    %227 = vector.extract_strided_slice %212 {offsets = [0, 384], sizes = [8, 128], strides = [1, 1]} : vector<8x512xf32> to vector<8x128xf32>
    %228 = arith.negf %227 : vector<8x128xf32>
    %229 = math.exp %228 : vector<8x128xf32>
    %cst_70 = arith.constant 1.000000e+00 : f32
    %230 = vector.broadcast %cst_70 : f32 to vector<8x128xf32>
    %231 = arith.addf %230, %229 : vector<8x128xf32>
    %232 = arith.divf %230, %231 : vector<8x128xf32>
    %233 = arith.mulf %224, %203 : vector<8x128xf32>
    %234 = arith.mulf %218, %226 : vector<8x128xf32>
    %235 = arith.addf %233, %234 : vector<8x128xf32>
    %236 = math.tanh %235 : vector<8x128xf32>
    %237 = arith.mulf %232, %236 : vector<8x128xf32>
    %c7_i32 = arith.constant 7 : i32
    %238 = arith.index_cast %c7_i32 : i32 to index
    %c0_71 = arith.constant 0 : index
    %c0_72 = arith.constant 0 : index
    %239 = vector.load %arg9[%238, %c0_71, %c0_72] : memref<8x8x512xf32, #tpu.memory_space<vmem>>, vector<1x8x512xf32>
    %240 = vector.shape_cast %239 : vector<1x8x512xf32> to vector<8x512xf32>
    %241 = arith.truncf %237 : vector<8x128xf32> to vector<8x128xbf16>
    %c0_73 = arith.constant 0 : index
    %c0_74 = arith.constant 0 : index
    %242 = vector.load %arg4[%c0_73, %c0_74] : memref<128x512xbf16, #tpu.memory_space<vmem>>, vector<128x512xbf16>
    %cst_75 = arith.constant dense<0.000000e+00> : vector<8x512xf32>
    %243 = tpu.matmul %241, %242, %cst_75 {dimension_numbers = #tpu.dot_dimension_numbers<[1], [0], [0], [1], [0, 0, 1, 1], [], []>} : vector<8x128xbf16>, vector<128x512xbf16>, vector<8x512xf32> -> vector<8x512xf32>
    %244 = arith.addf %240, %243 : vector<8x512xf32>
    %245 = vector.extract_strided_slice %244 {offsets = [0, 0], sizes = [8, 128], strides = [1, 1]} : vector<8x512xf32> to vector<8x128xf32>
    %246 = arith.negf %245 : vector<8x128xf32>
    %247 = math.exp %246 : vector<8x128xf32>
    %cst_76 = arith.constant 1.000000e+00 : f32
    %248 = vector.broadcast %cst_76 : f32 to vector<8x128xf32>
    %249 = arith.addf %248, %247 : vector<8x128xf32>
    %250 = arith.divf %248, %249 : vector<8x128xf32>
    %251 = vector.extract_strided_slice %244 {offsets = [0, 128], sizes = [8, 128], strides = [1, 1]} : vector<8x512xf32> to vector<8x128xf32>
    %252 = arith.negf %251 : vector<8x128xf32>
    %253 = math.exp %252 : vector<8x128xf32>
    %cst_77 = arith.constant 1.000000e+00 : f32
    %254 = vector.broadcast %cst_77 : f32 to vector<8x128xf32>
    %255 = arith.addf %254, %253 : vector<8x128xf32>
    %256 = arith.divf %254, %255 : vector<8x128xf32>
    %257 = vector.extract_strided_slice %244 {offsets = [0, 256], sizes = [8, 128], strides = [1, 1]} : vector<8x512xf32> to vector<8x128xf32>
    %258 = math.tanh %257 : vector<8x128xf32>
    %259 = vector.extract_strided_slice %244 {offsets = [0, 384], sizes = [8, 128], strides = [1, 1]} : vector<8x512xf32> to vector<8x128xf32>
    %260 = arith.negf %259 : vector<8x128xf32>
    %261 = math.exp %260 : vector<8x128xf32>
    %cst_78 = arith.constant 1.000000e+00 : f32
    %262 = vector.broadcast %cst_78 : f32 to vector<8x128xf32>
    %263 = arith.addf %262, %261 : vector<8x128xf32>
    %264 = arith.divf %262, %263 : vector<8x128xf32>
    %265 = arith.mulf %256, %235 : vector<8x128xf32>
    %266 = arith.mulf %250, %258 : vector<8x128xf32>
    %267 = arith.addf %265, %266 : vector<8x128xf32>
    %268 = math.tanh %267 : vector<8x128xf32>
    %269 = arith.mulf %264, %268 : vector<8x128xf32>
    %c8_i32 = arith.constant 8 : i32
    %c0_79 = arith.constant 0 : index
    %c0_80 = arith.constant 0 : index
    %270 = vector.load %arg10[%c0_79, %c0_80] : memref<8x128xf32, #tpu.memory_space<vmem>>, vector<8x128xf32>
    tpu.vector_store %arg10[%c0_79, %c0_80], %269 {strides = array<i32>} : memref<8x128xf32, #tpu.memory_space<vmem>>, vector<8x128xf32>,
    %c0_81 = arith.constant 0 : index
    %c0_82 = arith.constant 0 : index
    %271 = vector.load %arg11[%c0_81, %c0_82] : memref<8x128xf32, #tpu.memory_space<vmem>>, vector<8x128xf32>
    tpu.vector_store %arg11[%c0_81, %c0_82], %267 {strides = array<i32>} : memref<8x128xf32, #tpu.memory_space<vmem>>, vector<8x128xf32>,
    %c0_i32_83 = arith.constant 0 : i32
    %272 = arith.cmpi eq, %arg1, %c0_i32_83 : i32
    %273 = arith.extui %272 : i1 to i32
    %c0_i32_84 = arith.constant 0 : i32
    %274 = arith.cmpi ne, %273, %c0_i32_84 : i32
    scf.if %274 {
      %c0_85 = arith.constant 0 : index
      %c0_86 = arith.constant 0 : index
      %275 = vector.load %arg6[%c0_85, %c0_86] : memref<128x6xf32, #tpu.memory_space<vmem>>, vector<128x6xf32>
      %cst_87 = arith.constant dense<0.000000e+00> : vector<8x6xf32>
      %276 = tpu.matmul %269, %275, %cst_87 {dimension_numbers = #tpu.dot_dimension_numbers<[1], [0], [0], [1], [0, 0, 1, 1], [], []>} : vector<8x128xf32>, vector<128x6xf32>, vector<8x6xf32> -> vector<8x6xf32>
      %c0_88 = arith.constant 0 : index
      %c0_89 = arith.constant 0 : index
      %277 = vector.load %arg7[%c0_88, %c0_89] : memref<1x6xf32, #tpu.memory_space<vmem>>, vector<1x6xf32>
      %278 = vector.broadcast %277 : vector<1x6xf32> to vector<8x6xf32>
      %279 = arith.addf %276, %278 : vector<8x6xf32>
      %c0_90 = arith.constant 0 : index
      %c0_91 = arith.constant 0 : index
      %280 = vector.load %arg8[%c0_90, %c0_91] : memref<8x6xf32, #tpu.memory_space<vmem>>, vector<8x6xf32>
      tpu.vector_store %arg8[%c0_90, %c0_91], %279 {strides = array<i32>} : memref<8x6xf32, #tpu.memory_space<vmem>>, vector<8x6xf32>,
    } else {
    }
    return
  }
  func.func @transform_0(%arg0: i32, %arg1: i32) -> (i32, i32, i32) {
    %c0_i32 = arith.constant 0 : i32
    %c0_i32_0 = arith.constant 0 : i32
    return %arg1, %arg0, %c0_i32 : i32, i32, i32
  }
  func.func @transform_1(%arg0: i32, %arg1: i32) -> (i32, i32) {
    %c0_i32 = arith.constant 0 : i32
    %c0_i32_0 = arith.constant 0 : i32
    %c0_i32_1 = arith.constant 0 : i32
    return %c0_i32, %c0_i32_0 : i32, i32
  }
  func.func @transform_2(%arg0: i32, %arg1: i32) -> (i32, i32) {
    %c0_i32 = arith.constant 0 : i32
    %c0_i32_0 = arith.constant 0 : i32
    %c0_i32_1 = arith.constant 0 : i32
    return %c0_i32, %c0_i32_0 : i32, i32
  }
  func.func @transform_3(%arg0: i32, %arg1: i32) -> (i32, i32) {
    %c0_i32 = arith.constant 0 : i32
    %c0_i32_0 = arith.constant 0 : i32
    %c0_i32_1 = arith.constant 0 : i32
    return %c0_i32, %c0_i32_0 : i32, i32
  }
  func.func @transform_4(%arg0: i32, %arg1: i32) -> (i32, i32) {
    %c0_i32 = arith.constant 0 : i32
    %c0_i32_0 = arith.constant 0 : i32
    %c0_i32_1 = arith.constant 0 : i32
    return %c0_i32, %c0_i32_0 : i32, i32
  }
  func.func @transform_5(%arg0: i32, %arg1: i32) -> (i32, i32) {
    %c0_i32 = arith.constant 0 : i32
    %c0_i32_0 = arith.constant 0 : i32
    %c0_i32_1 = arith.constant 0 : i32
    return %c0_i32, %c0_i32_0 : i32, i32
  }
  func.func @transform_6(%arg0: i32, %arg1: i32) -> (i32, i32) {
    %c0_i32 = arith.constant 0 : i32
    %c0_i32_0 = arith.constant 0 : i32
    return %arg0, %c0_i32 : i32, i32
  }
}

</mosaic_0001>

<bundles_post_ra>
// kernel: tpu_custom_call.1
= control target key start
LH: loop header
LB: loop body
LE: loop exit
PB: predicated region body
PF: predicated region fallthrough
CT: control target
= control target key end

     0   :  { %11 = vsyncpa [#allocation6], 0  ;;  %s2653_s0 = inlined_call_operand.vmem [shape: bf16[8,8,3], index: 0, kind: input, shape index: {}]   ;;  %s2654_s1 = inlined_call_operand.vmem [shape: bf16[3,512], index: 1, kind: input, shape index: {}]   ;;  %s2655_s2 = inlined_call_operand.hbm [shape: bf16[128,512], index: 2, kind: input, shape index: {}]   ;;  %s2656_s3 = inlined_call_operand.vmem [shape: f32[1,512], index: 3, kind: input, shape index: {}]   ;;  %s2657_s4 = inlined_call_operand.vmem [shape: f32[128,6], index: 4, kind: input, shape index: {}]   ;;  %s2658_s5 = inlined_call_operand.vmem [shape: f32[1,6], index: 5, kind: input, shape index: {}]   ;;  %s2659_s6 = inlined_call_operand.hbm [shape: f32[8,6], index: 6, kind: output, shape index: {}]  }
   0x1   :  { %12 = vsyncpa [#allocation7], 0  ;;  %s1973_s21 = smov [#allocation5]   ;;  %s1925_s25 = scalar_lea.hbm %s2655_s2, 4096 }
   0x2   :  { %s22_s22 = sshll.u32 %s1973_s21, 4  ;;  %p1926_p0 = scmp.ne.s32.totalorder %s2655_s2, %s1925_s25  ;;  %s23_s22 = int_to_ptr.vmem [resolvable:$true] %s22_s22 }
   0x3   :  { %p1929_p1 = scmp.lt.u32.totalorder %s1925_s25, %s2655_s2 }
   0x5   :  { %p1931_p2 = pnand %p1929_p1, %p1926_p0 }
   0x7   :  { %1934 = shalt.err (!%p1931_p2)
}
   0x8   :  { %s1935_s30 = scalar_lea.vmem %s23_s22, 4096  ;;  %p1940_p4 = scmp.lt.s32.totalorder %s23_s22, %s23_s22 }
   0x9   :  { %p1936_p3 = scmp.ne.s32.totalorder %s23_s22, %s1935_s30  ;;  %p1941_p5 = scmp.lt.s32.totalorder %s1935_s30, %s1935_s30 }
   0xb   :  { %p1942_p6 = por %p1941_p5, %p1940_p4 }
   0xd   :  { %p1943_p7 = pnand %p1942_p6, %p1936_p3 }
   0xf   :  { %1946 = shalt.err (!%p1943_p7)
}
  0x10   :  { %s1974_s7 = smov 256   ;;  %s1975_s8 = smov 16  }
  0x11   :  { %28 = dma.hbm_to_vmem [thread:$0]  %s2655_s2, 4096, %s23_s22, [#allocation6], %s1974_s7, %s1974_s7, %s1975_s8  }
  0x12   :  { %1969 = dma.done.wait [#allocation6], 4096  }
  0x13   :  { %1970 = vsyncadd [#allocation6], 4294963200  ;;  %v56_v0 = vlaneseq  ;;  %v1976_v1 = vmov 1983009808   ;;  %vm127_vm0 = vcmask 1040384   ;;  %v2662_v4 = vmov 0  }
  0x14   :  { %v99_v2 = vunpack.c.l.s4 %v1976_v1  ;;  %175 = vmatprep.mubr.bf16.mxu0 %v2662_v4  ;;  %248 = vmatprep.mubr.bf16.mxu1 %v2662_v4  ;;  %vm128_vm1 = vcmask 1041408   ;;  %v1978_v7 = vmov 65535   ;;  %v53_v9 = vld [vmem:[%s2654_s1] sm:$0xff]  ;;  %v2043_v22 = vld [vmem:[#allocation5 + $0xc] ss:$16 sps:$4 sm:$0xff]   ;;  %vm114_vm2 = vcmask 23552  }
  0x15   :  { %v2030_v3 = vshrl.u32 %v56_v0, 7  ;;  %v129_v8 = vsel %vm127_vm0, 4294967295, %v1978_v7  ;;  %v97_v12 = vcombine.high %v53_v9, %v53_v9  ;;  %v2038_v18 = vld [vmem:[#allocation5 + $0x4] ss:$16 sps:$4 sm:$0xff]   ;;  %v2045_v23 = vld [vmem:[#allocation5] ss:$16 sps:$4 sm:$0xff]  }
  0x16   :  { %v100_v5 = vunpack.c.0.s8 %v99_v2  ;;  %v130_v11 = vsel %vm128_vm1, %v129_v8, 0  ;;  %v1713_v20 = vld [vmem:[%s2653_s0] sm:$0xff]   ;;  %v2050_v25 = vld [vmem:[#allocation5 + $0x8] ss:$16 sps:$4 sm:$0xff]   ;;  %v2054_v26 = vld [vmem:[#allocation5 + $0x2c] ss:$16 sps:$4 sm:$0xff]  }
  0x17   :  { %v2048_v24 = vld [vmem:[#allocation5 + $0x24] ss:$16 sps:$4 sm:$0xff]   ;;  %v2057_v27 = vld [vmem:[#allocation5 + $0x20] ss:$16 sps:$4 sm:$0xff]   ;;  %v2060_v28 = vld [vmem:[#allocation5 + $0x28] ss:$16 sps:$4 sm:$0xff]  }
  0x18   :  { %v103_v6 = vsub.s32 %v100_v5, %v2030_v3  ;;  %v2064_v29 = vld [vmem:[#allocation5 + $0x44] ss:$16 sps:$4 sm:$0xff]   ;;  %v1726_v30 = vld [vmem:[%s2653_s0 + $0x8] sm:$0xff]   ;;  %v2075_v32 = vld [vmem:[#allocation5 + $0x40] ss:$16 sps:$4 sm:$0xff]   ;;  %v2660_v56 = vmov 0.0|0.0  }
  0x19   :  { %v2072_v31 = vld [vmem:[#allocation5 + $0x4c] ss:$16 sps:$4 sm:$0xff]   ;;  %v2078_v33 = vld [vmem:[#allocation5 + $0x64] ss:$16 sps:$4 sm:$0xff]   ;;  %v2081_v34 = vld [vmem:[#allocation5 + $0x48] ss:$16 sps:$4 sm:$0xff]  }
  0x1a   :  { %v104_v10 = vrot.slane %v53_v9, %v103_v6  ;;  %v111_v14 = vrot.slane %v97_v12, %v103_v6  ;;  %v2085_v35 = vld [vmem:[#allocation5 + $0x6c] ss:$16 sps:$4 sm:$0xff]   ;;  %v2088_v36 = vld [vmem:[#allocation5 + $0x60] ss:$16 sps:$4 sm:$0xff]   ;;  %v2093_v37 = vld [vmem:[#allocation5 + $0x84] ss:$16 sps:$4 sm:$0xff]  }
  0x1b   :  { %v2096_v38 = vld [vmem:[#allocation5 + $0x68] ss:$16 sps:$4 sm:$0xff]   ;;  %v1739_v39 = vld [vmem:[%s2653_s0 + $0x10] sm:$0xff]   ;;  %v2103_v40 = vld [vmem:[#allocation5 + $0x8c] ss:$16 sps:$4 sm:$0xff]   ;;  %v58_v57 = vsub.s32 0, %v2030_v3 }
  0x1c   :  { %v112_v13 = vcombine.high %v104_v10, %v104_v10  ;;  %v132_v15 = vand.u32 %v130_v11, %v104_v10  ;;  %v113_v17 = vcombine.high %v111_v14, %v111_v14  ;;  %v138_v19 = vand.u32 %v130_v11, %v111_v14  ;;  %v2106_v41 = vld [vmem:[#allocation5 + $0x80] ss:$16 sps:$4 sm:$0xff]   ;;  %v2109_v42 = vld [vmem:[#allocation5 + $0xa4] ss:$16 sps:$4 sm:$0xff]   ;;  %v2112_v43 = vld [vmem:[#allocation5 + $0x88] ss:$16 sps:$4 sm:$0xff]  }
  0x1d   :  { %v2116_v44 = vld [vmem:[#allocation5 + $0xac] ss:$16 sps:$4 sm:$0xff]   ;;  %v2119_v45 = vld [vmem:[#allocation5 + $0xa0] ss:$16 sps:$4 sm:$0xff]   ;;  %v2124_v46 = vld [vmem:[#allocation5 + $0xc4] ss:$16 sps:$4 sm:$0xff]  }
  0x1e   :  { %v135_v16 = vand.u32 %v130_v11, %v112_v13  ;;  %v141_v21 = vand.u32 %v130_v11, %v113_v17  ;;  %v2127_v47 = vld [vmem:[#allocation5 + $0xa8] ss:$16 sps:$4 sm:$0xff]   ;;  %v2134_v49 = vld [vmem:[#allocation5 + $0xcc] ss:$16 sps:$4 sm:$0xff]   ;;  %v2137_v50 = vld [vmem:[#allocation5 + $0xc0] ss:$16 sps:$4 sm:$0xff]  }
  0x1f   :  { %v1752_v48 = vld [vmem:[%s2653_s0 + $0x18] sm:$0xff]   ;;  %v2140_v51 = vld [vmem:[#allocation5 + $0xe4] ss:$16 sps:$4 sm:$0xff]   ;;  %v2150_v54 = vld [vmem:[#allocation5 + $0xe0] ss:$16 sps:$4 sm:$0xff]   ;;  %v66_v58 = vsub.s32 2, %v2030_v3 }
  0x20   :  { %143 = vmatprep.subr.bf16.mxu0 %v135_v16  ;;  %216 = vmatprep.subr.bf16.mxu1 %v141_v21  ;;  %v2143_v52 = vld [vmem:[#allocation5 + $0xc8] ss:$16 sps:$4 sm:$0xff]   ;;  %v2147_v53 = vld [vmem:[#allocation5 + $0xec] ss:$16 sps:$4 sm:$0xff]   ;;  %v54_v59 = vld [vmem:[%s2656_s3] sm:$0xf] }
  0x21   :  { %144 = vmatpush1.bf16.msra.mxu0 %v132_v15  ;;  %217 = vmatpush1.bf16.msra.mxu1 %v138_v19  ;;  %v2156_v55 = vld [vmem:[#allocation5 + $0xe8] ss:$16 sps:$4 sm:$0xff]   ;;  %v62_v60 = vsub.s32 1, %v2030_v3  ;;  %v70_v61 = vsub.s32 3, %v2030_v3  ;;  %v2209_v63 = vrot.slane %v54_v59, %v58_v57  ;;  %v2213_v1 = vrot.slane %v54_v59, %v66_v58  ;;  %s1982_s24 = smov [#allocation8]  }
  0x22   :  { %520 = vmatprep.subr.bf16.mxu0 %v2038_v18  ;;  %561 = vmatprep.subr.bf16.mxu1 %v2043_v22  ;;  %vm1980_vm3 = vmmov 0   ;;  %s1548_s25 = sshll.u32 %s1982_s24, 4  ;;  %vm1540_vm4 = vcmask 48128   ;;  %s1549_s25 = int_to_ptr.vmem [resolvable:$true] %s1548_s25 }
  0x23   :  { %v63_v2 = vrot.slane %v54_v59, %v62_v60  ;;  %v2215_v7 = vrot.slane %v54_v59, %v70_v61  ;;  %s1947_s26 = scalar_lea.vmem %s1549_s25, 128  ;;  %p1952_p9 = scmp.lt.s32.totalorder %s1549_s25, %s1549_s25 }
  0x24   :  { %1561 = vmatmul.mubr.msk.bf16.vlgmr.msra.gmra.mrb[0].mxu0 %vm114_vm2, %v1713_v20  ;;  %1565 = vmatmul.mubr.msk.bf16.vlgmr.msra.gmra.mrb[0].mxu1 %vm114_vm2, %v1713_v20  ;;  %p1948_p8 = scmp.ne.s32.totalorder %s1549_s25, %s1947_s26  ;;  %p1953_p10 = scmp.lt.s32.totalorder %s1947_s26, %s1947_s26 }
  0x25   :  { %521 = vmatpush1.bf16.msra.mxu0 %v2045_v23  ;;  %185 = vmatprep.mubr.bf16.mxu0 %v2662_v4 }
  0x26   :  { %522 = vmatprep.subr.bf16.mxu0 %v2048_v24  ;;  %562 = vmatpush1.bf16.msra.mxu1 %v2050_v25  ;;  %p1954_p11 = por %p1953_p10, %p1952_p9 }
  0x27   :  { %258 = vmatprep.mubr.bf16.mxu1 %v2662_v4  ;;  %563 = vmatprep.subr.bf16.mxu1 %v2054_v26 }
  0x28   :  { %p1955_p12 = pnand %p1954_p11, %p1948_p8 }
  0x29   :  { %523 = vmatpush1.bf16.msra.mxu0 %v2057_v27 }
  0x2a   :  { %524 = vmatprep.subr.bf16.mxu0 %v2064_v29  ;;  %564 = vmatpush1.bf16.msra.mxu1 %v2060_v28 }
  0x2b   :  { %565 = vmatprep.subr.bf16.mxu1 %v2072_v31 }
  0x2c   :  { %1562 = vmatmul.mubr.msk.bf16.gmra.mrb[4].mxu0 %vm114_vm2, %v1726_v30  ;;  %1566 = vmatmul.mubr.msk.bf16.gmra.mrb[4].mxu1 %vm114_vm2, %v1726_v30 }
  0x2d   :  { %525 = vmatpush1.bf16.msra.mxu0 %v2075_v32  ;;  %195 = vmatprep.mubr.bf16.mxu0 %v2662_v4 }
  0x2e   :  { %526 = vmatprep.subr.bf16.mxu0 %v2078_v33  ;;  %566 = vmatpush1.bf16.msra.mxu1 %v2081_v34 }
  0x2f   :  { %268 = vmatprep.mubr.bf16.mxu1 %v2662_v4  ;;  %567 = vmatprep.subr.bf16.mxu1 %v2085_v35 }
  0x31   :  { %527 = vmatpush1.bf16.msra.mxu0 %v2088_v36 }
  0x32   :  { %528 = vmatprep.subr.bf16.mxu0 %v2093_v37  ;;  %568 = vmatpush1.bf16.msra.mxu1 %v2096_v38 }
  0x33   :  { %569 = vmatprep.subr.bf16.mxu1 %v2103_v40 }
  0x34   :  { %1563 = vmatmul.mubr.msk.bf16.gmra.mrb[8].mxu0 %vm114_vm2, %v1739_v39  ;;  %1567 = vmatmul.mubr.msk.bf16.gmra.mrb[8].mxu1 %vm114_vm2, %v1739_v39 }
  0x35   :  { %529 = vmatpush1.bf16.msra.mxu0 %v2106_v41  ;;  %205 = vmatprep.mubr.bf16.mxu0 %v2662_v4 }
  0x36   :  { %530 = vmatprep.subr.bf16.mxu0 %v2109_v42  ;;  %570 = vmatpush1.bf16.msra.mxu1 %v2112_v43 }
  0x37   :  { %278 = vmatprep.mubr.bf16.mxu1 %v2662_v4  ;;  %571 = vmatprep.subr.bf16.mxu1 %v2116_v44 }
  0x39   :  { %531 = vmatpush1.bf16.msra.mxu0 %v2119_v45 }
  0x3a   :  { %532 = vmatprep.subr.bf16.mxu0 %v2124_v46  ;;  %572 = vmatpush1.bf16.msra.mxu1 %v2127_v47 }
  0x3b   :  { %573 = vmatprep.subr.bf16.mxu1 %v2134_v49 }
  0x3c   :  { %1564 = vmatmul.mubr.msk.bf16.gmra.mrb[12].mxu0 %vm114_vm2, %v1752_v48  ;;  %1568 = vmatmul.mubr.msk.bf16.gmra.mrb[12].mxu1 %vm114_vm2, %v1752_v48 }
  0x3d   :  { %533 = vmatpush1.bf16.msra.mxu0 %v2137_v50  ;;  %552 = vmatprep.mubr.bf16.mxu0 %v2662_v4 }
  0x3e   :  { %534 = vmatprep.subr.bf16.mxu0 %v2140_v51  ;;  %574 = vmatpush1.bf16.msra.mxu1 %v2143_v52 }
  0x3f   :  { %593 = vmatprep.mubr.bf16.mxu1 %v2662_v4  ;;  %575 = vmatprep.subr.bf16.mxu1 %v2147_v53 }
  0x41   :  { %535 = vmatpush1.bf16.msra.mxu0 %v2150_v54 }
  0x42   :  { %636 = vmatprep.subr.bf16.mxu0 %v2038_v18  ;;  %576 = vmatpush1.bf16.msra.mxu1 %v2156_v55 }
  0x43   :  { %677 = vmatprep.subr.bf16.mxu1 %v2043_v22 }
  0x44   :  { %553 = vmatmul.mubr.bf16.vlgmr.msra.gmra.mrb[16].mxu0 %v2660_v56 }
  0x45   :  { %637 = vmatpush1.bf16.msra.mxu0 %v2045_v23  ;;  %668 = vmatprep.mubr.bf16.mxu0 %v2662_v4 }
  0x46   :  { %594 = vmatmul.mubr.bf16.vlgmr.msra.gmra.mrb[16].mxu1 %v2660_v56  ;;  %638 = vmatprep.subr.bf16.mxu0 %v2048_v24 }
  0x47   :  { %678 = vmatpush1.bf16.msra.mxu1 %v2050_v25  ;;  %709 = vmatprep.mubr.bf16.mxu1 %v2662_v4 }
  0x48   :  { %679 = vmatprep.subr.bf16.mxu1 %v2054_v26 }
  0x49   :  { %639 = vmatpush1.bf16.msra.mxu0 %v2057_v27 }
  0x4a   :  { %640 = vmatprep.subr.bf16.mxu0 %v2064_v29 }
  0x4b   :  { %680 = vmatpush1.bf16.msra.mxu1 %v2060_v28 }
  0x4c   :  { %681 = vmatprep.subr.bf16.mxu1 %v2072_v31 }
  0x4d   :  { %641 = vmatpush1.bf16.msra.mxu0 %v2075_v32 }
  0x4e   :  { %642 = vmatprep.subr.bf16.mxu0 %v2078_v33 }
  0x4f   :  { %682 = vmatpush1.bf16.msra.mxu1 %v2081_v34 }
  0x50   :  { %683 = vmatprep.subr.bf16.mxu1 %v2085_v35 }
  0x51   :  { %643 = vmatpush1.bf16.msra.mxu0 %v2088_v36 }
  0x52   :  { %644 = vmatprep.subr.bf16.mxu0 %v2093_v37 }
  0x53   :  { %684 = vmatpush1.bf16.msra.mxu1 %v2096_v38 }
  0x54   :  { %685 = vmatprep.subr.bf16.mxu1 %v2103_v40 }
  0x55   :  { %645 = vmatpush1.bf16.msra.mxu0 %v2106_v41 }
  0x56   :  { %646 = vmatprep.subr.bf16.mxu0 %v2109_v42 }
  0x57   :  { %686 = vmatpush1.bf16.msra.mxu1 %v2112_v43 }
  0x58   :  { %687 = vmatprep.subr.bf16.mxu1 %v2116_v44 }
  0x59   :  { %647 = vmatpush1.bf16.msra.mxu0 %v2119_v45 }
  0x5a   :  { %648 = vmatprep.subr.bf16.mxu0 %v2124_v46 }
  0x5b   :  { %688 = vmatpush1.bf16.msra.mxu1 %v2127_v47 }
  0x5c   :  { %689 = vmatprep.subr.bf16.mxu1 %v2134_v49 }
  0x5d   :  { %649 = vmatpush1.bf16.msra.mxu0 %v2137_v50 }
  0x5e   :  { %650 = vmatprep.subr.bf16.mxu0 %v2140_v51 }
  0x5f   :  { %690 = vmatpush1.bf16.msra.mxu1 %v2143_v52 }
  0x60   :  { %691 = vmatprep.subr.bf16.mxu1 %v2147_v53 }
  0x61   :  { %651 = vmatpush1.bf16.msra.mxu0 %v2150_v54 }
  0x62   :  { %752 = vmatprep.subr.bf16.mxu0 %v2038_v18 }
  0x63   :  { %692 = vmatpush1.bf16.msra.mxu1 %v2156_v55 }
  0x64   :  { %793 = vmatprep.subr.bf16.mxu1 %v2043_v22 }
  0xf7   :  { %v2207_v62 = vpop.f32.mrb[0].mxu0  ;;  %v250_v6 = vpop.f32.mrb[0].mxu1 }
  0xf8   :  { %v2211_v0 = vpop.f32.mrb[1].mxu0  ;;  %v252_v10 = vpop.f32.mrb[1].mxu1 }
  0xf9   :  { %v181_v5 = vpop.f32.mrb[2].mxu0  ;;  %v254_v3 = vpop.f32.mrb[2].mxu1 }
  0xfa   :  { %v2218_v8 = vadd.f32 %v181_v5, %v2209_v63  ;;  %v183_v9 = vpop.f32.mrb[3].mxu0  ;;  %v2223_v12 = vadd.f32 %v254_v3, %v2213_v1  ;;  %v256_v13 = vpop.f32.mrb[3].mxu1 }
  0xfb   :  { %v2220_v11 = vadd.f32 %v183_v9, %v63_v2  ;;  %v2226_v14 = vadd.f32 %v256_v13, %v2215_v7 }
  0xff   :  { %v187_v15 = vpop.f32.mrb[4].mxu0  ;;  %v260_v21 = vpop.f32.mrb[4].mxu1 }
 0x100   :  { %v2229_v16 = vadd.f32 %v187_v15, %v2209_v63  ;;  %v189_v17 = vpop.f32.mrb[5].mxu0  ;;  %v2237_v48 = vadd.f32 %v260_v21, %v2213_v1  ;;  %v262_v57 = vpop.f32.mrb[5].mxu1 }
 0x101   :  { %v2231_v19 = vadd.f32 %v189_v17, %v63_v2  ;;  %v191_v20 = vpop.f32.mrb[6].mxu0  ;;  %v2242_v59 = vadd.f32 %v262_v57, %v2215_v7  ;;  %v264_v60 = vpop.f32.mrb[6].mxu1 }
 0x102   :  { %v2234_v30 = vadd.f32 %v191_v20, %v2209_v63  ;;  %v193_v39 = vpop.f32.mrb[7].mxu0  ;;  %v2245_v61 = vadd.f32 %v264_v60, %v2213_v1  ;;  %v266_v5 = vpop.f32.mrb[7].mxu1 }
 0x103   :  { %v2239_v58 = vadd.f32 %v193_v39, %v63_v2  ;;  %2666 = vst [vmem:[#allocation13_spill] sm:$0xff] %v2242_v59  ;;  %v2248_v9 = vadd.f32 %v266_v5, %v2215_v7 }
 0x104   :  { %2664 = vst [vmem:[#allocation11_spill] sm:$0xff] %v2234_v30  ;;  %2667 = vst [vmem:[#allocation14_spill] sm:$0xff] %v2245_v61 }
 0x105   :  { %2665 = vst [vmem:[#allocation12_spill] sm:$0xff] %v2239_v58  ;;  %2668 = vst [vmem:[#allocation15_spill] sm:$0xff] %v2248_v9 }
 0x107   :  { %v197_v3 = vpop.f32.mrb[8].mxu0  ;;  %v270_v21 = vpop.f32.mrb[8].mxu1 }
 0x108   :  { %v2251_v13 = vadd.f32 %v197_v3, %v2209_v63  ;;  %v199_v15 = vpop.f32.mrb[9].mxu0  ;;  %v2259_v60 = vadd.f32 %v270_v21, %v2213_v1  ;;  %v272_v56 = vpop.f32.mrb[9].mxu1 }
 0x109   :  { %v2253_v17 = vadd.f32 %v199_v15, %v63_v2  ;;  %v201_v20 = vpop.f32.mrb[10].mxu0  ;;  %v2264_v5 = vadd.f32 %v272_v56, %v2215_v7  ;;  %v274_v3 = vpop.f32.mrb[10].mxu1 }
 0x10a   :  { %2669 = vst [vmem:[#allocation16_spill] sm:$0xff] %v2251_v13  ;;  %v2256_v39 = vadd.f32 %v201_v20, %v2209_v63  ;;  %v203_v57 = vpop.f32.mrb[11].mxu0  ;;  %2672 = vst [vmem:[#allocation19_spill] sm:$0xff] %v2259_v60  ;;  %v2267_v13 = vadd.f32 %v274_v3, %v2213_v1  ;;  %v276_v15 = vpop.f32.mrb[11].mxu1 }
 0x10b   :  { %2670 = vst [vmem:[#allocation17_spill] sm:$0xff] %v2253_v17  ;;  %v2261_v4 = vadd.f32 %v203_v57, %v63_v2  ;;  %2674 = vst [vmem:[#allocation21_spill] sm:$0xff] %v2264_v5  ;;  %v2270_v17 = vadd.f32 %v276_v15, %v2215_v7 }
 0x10c   :  { %2671 = vst [vmem:[#allocation18_spill] sm:$0xff] %v2256_v39  ;;  %2675 = vst [vmem:[#allocation22_spill] sm:$0xff] %v2267_v13 }
 0x10d   :  { %2673 = vst [vmem:[#allocation20_spill] sm:$0xff] %v2261_v4  ;;  %2676 = vst [vmem:[#allocation23_spill] sm:$0xff] %v2270_v17 }
 0x10f   :  { %v207_v20 = vpop.f32.mrb[12].mxu0  ;;  %v280_v4 = vpop.f32.mrb[12].mxu1 }
 0x110   :  { %v2273_v39 = vadd.f32 %v207_v20, %v2209_v63  ;;  %v209_v21 = vpop.f32.mrb[13].mxu0  ;;  %v2281_v3 = vadd.f32 %v280_v4, %v2213_v1  ;;  %v282_v13 = vpop.f32.mrb[13].mxu1  ;;  %v180_v4 = vadd.f32 %v2211_v0, %v63_v2 }
 0x111   :  { %v2275_v60 = vadd.f32 %v209_v21, %v63_v2  ;;  %v211_v57 = vpop.f32.mrb[14].mxu0  ;;  %v2286_v15 = vadd.f32 %v282_v13, %v2215_v7  ;;  %v284_v20 = vpop.f32.mrb[14].mxu1  ;;  %v253_v13 = vadd.f32 %v252_v10, %v2215_v7 }
 0x112   :  { %2677 = vst [vmem:[#allocation24_spill] sm:$0xff] %v2273_v39  ;;  %v2278_v56 = vadd.f32 %v211_v57, %v2209_v63  ;;  %v213_v5 = vpop.f32.mrb[15].mxu0  ;;  %2680 = vst [vmem:[#allocation27_spill] sm:$0xff] %v2281_v3  ;;  %v2289_v39 = vadd.f32 %v284_v20, %v2213_v1  ;;  %v286_v21 = vpop.f32.mrb[15].mxu1  ;;  %v178_v57 = vadd.f32 %v2207_v62, %v2209_v63 }
 0x113   :  { %2678 = vst [vmem:[#allocation25_spill] sm:$0xff] %v2275_v60  ;;  %v2283_v9 = vadd.f32 %v213_v5, %v63_v2  ;;  %2682 = vst [vmem:[#allocation29_spill] sm:$0xff] %v2286_v15  ;;  %v2292_v60 = vadd.f32 %v286_v21, %v2215_v7  ;;  %v251_v5 = vadd.f32 %v250_v6, %v2213_v1 }
 0x114   :  { %2679 = vst [vmem:[#allocation26_spill] sm:$0xff] %v2278_v56  ;;  %2683 = vst [vmem:[#allocation30_spill] sm:$0xff] %v2289_v39 }
 0x115   :  { %2681 = vst [vmem:[#allocation28_spill] sm:$0xff] %v2283_v9  ;;  %2684 = vst [vmem:[#allocation31_spill] sm:$0xff] %v2292_v60 }
 0x117   :  { %v554_v56 = vpop.f32.mrb[16].mxu0 }
 0x118   :  { %v602_v9 = vadd.f32 %v554_v56, %v178_v57  ;;  %v556_v3 = vpop.f32.mrb[17].mxu0 }
 0x119   :  { %v603_v15 = vadd.f32 %v556_v3, %v180_v4  ;;  %v558_v17 = vpop.f32.mrb[18].mxu0  ;;  %v595_v20 = vpop.f32.mrb[16].mxu1 }
 0x11a   :  { %v1601_v39 = vmul.f32 -1.442695, %v602_v9  ;;  %v604_v58 = vadd.f32 %v595_v20, %v251_v5  ;;  %v559_v61 = vpop.f32.mrb[19].mxu0  ;;  %v597_v21 = vpop.f32.mrb[17].mxu1 }
 0x11b   :  { %v1602_v60 = vmul.f32 -1.442695, %v603_v15  ;;  %v605_v30 = vadd.f32 %v597_v21, %v253_v13  ;;  %v599_v59 = vpop.f32.mrb[18].mxu1 }
 0x11c   :  { %1765 = vpow2.f32 %v1601_v39  ;;  %v600_v62 = vpop.f32.mrb[19].mxu1 }
 0x11d   :  { %1767 = vpow2.f32 %v1602_v60  ;;  %v1603_v63 = vmul.f32 -1.442695, %v605_v30 }
 0x11f   :  { %1769 = vpow2.f32 %v1603_v63 }
 0x120   :  { %1771 = vtanh.f32 %v604_v58  ;;  %v2685_v58 = vmov 0  }
 0x126   :  { %v1766_v0 = vpop.eup %1765 }
 0x127   :  { %v1768_v1 = vpop.eup %1767  ;;  %v609_v2 = vadd.f32 1.0, %v1766_v0 }
 0x128   :  { %v615_v6 = vadd.f32 1.0, %v1768_v1 }
 0x129   :  { %1773 = vrcp.f32 %v609_v2  ;;  %v1770_v7 = vpop.eup %1769 }
 0x12a   :  { %1775 = vrcp.f32 %v615_v6  ;;  %v1772_v10 = vpop.eup %1771  ;;  %v622_v56 = vadd.f32 1.0, %v1770_v7 }
 0x12c   :  { %1777 = vrcp.f32 %v622_v56 }
 0x133   :  { %v1774_v9 = vpop.eup %1773 }
 0x134   :  { %v1776_v61 = vpop.eup %1775  ;;  %v626_v17 = vmul.f32 %v1774_v9, %v1772_v10 }
 0x135   :  { %v625_v3 = vmul.f32 0.0, %v1776_v61 }
 0x136   :  { %v1778_v30 = vpop.eup %1777 }
 0x137   :  { %v2299_v59 = vadd.f32 %v626_v17, %v625_v3 }
 0x139   :  { %1779 = vtanh.f32 %v2299_v59 }
 0x143   :  { %v1780_v39 = vpop.eup %1779 }
 0x144   :  { %v629_v60 = vmul.f32 %v1780_v39, %v1778_v30 }
 0x146   :  { %v635_v15 = vpack.c.bf16 %v629_v60, %v629_v60 }
 0x148   :  { %669 = vmatmul.mubr.bf16.vlgmr.msra.gmra.mrb[20].mxu0 %v635_v15  ;;  %710 = vmatmul.mubr.bf16.vlgmr.msra.gmra.mrb[20].mxu1 %v635_v15 }
 0x149   :  { %753 = vmatpush1.bf16.msra.mxu0 %v2045_v23  ;;  %794 = vmatpush1.bf16.msra.mxu1 %v2050_v25 }
 0x14a   :  { %754 = vmatprep.subr.bf16.mxu0 %v2048_v24  ;;  %795 = vmatprep.subr.bf16.mxu1 %v2054_v26 }
 0x14b   :  { %784 = vmatprep.mubr.bf16.mxu0 %v2685_v58  ;;  %825 = vmatprep.mubr.bf16.mxu1 %v2685_v58 }
 0x14d   :  { %755 = vmatpush1.bf16.msra.mxu0 %v2057_v27  ;;  %796 = vmatpush1.bf16.msra.mxu1 %v2060_v28 }
 0x14e   :  { %756 = vmatprep.subr.bf16.mxu0 %v2064_v29  ;;  %797 = vmatprep.subr.bf16.mxu1 %v2072_v31 }
 0x151   :  { %757 = vmatpush1.bf16.msra.mxu0 %v2075_v32  ;;  %798 = vmatpush1.bf16.msra.mxu1 %v2081_v34 }
 0x152   :  { %758 = vmatprep.subr.bf16.mxu0 %v2078_v33  ;;  %799 = vmatprep.subr.bf16.mxu1 %v2085_v35 }
 0x155   :  { %759 = vmatpush1.bf16.msra.mxu0 %v2088_v36  ;;  %800 = vmatpush1.bf16.msra.mxu1 %v2096_v38 }
 0x156   :  { %760 = vmatprep.subr.bf16.mxu0 %v2093_v37  ;;  %801 = vmatprep.subr.bf16.mxu1 %v2103_v40 }
 0x159   :  { %761 = vmatpush1.bf16.msra.mxu0 %v2106_v41  ;;  %802 = vmatpush1.bf16.msra.mxu1 %v2112_v43 }
 0x15a   :  { %762 = vmatprep.subr.bf16.mxu0 %v2109_v42  ;;  %803 = vmatprep.subr.bf16.mxu1 %v2116_v44 }
 0x15d   :  { %763 = vmatpush1.bf16.msra.mxu0 %v2119_v45  ;;  %804 = vmatpush1.bf16.msra.mxu1 %v2127_v47 }
 0x15e   :  { %764 = vmatprep.subr.bf16.mxu0 %v2124_v46  ;;  %805 = vmatprep.subr.bf16.mxu1 %v2134_v49 }
 0x161   :  { %765 = vmatpush1.bf16.msra.mxu0 %v2137_v50  ;;  %806 = vmatpush1.bf16.msra.mxu1 %v2143_v52 }
 0x162   :  { %766 = vmatprep.subr.bf16.mxu0 %v2140_v51  ;;  %807 = vmatprep.subr.bf16.mxu1 %v2147_v53 }
 0x165   :  { %767 = vmatpush1.bf16.msra.mxu0 %v2150_v54  ;;  %808 = vmatpush1.bf16.msra.mxu1 %v2156_v55 }
 0x166   :  { %868 = vmatprep.subr.bf16.mxu0 %v2038_v18  ;;  %909 = vmatprep.subr.bf16.mxu1 %v2043_v22 }
 0x21b   :  { %v670_v57 = vpop.f32.mrb[20].mxu0  ;;  %v711_v4 = vpop.f32.mrb[20].mxu1 }
 0x21c   :  { %v718_v5 = vadd.f32 %v670_v57, %v2218_v8  ;;  %v720_v13 = vadd.f32 %v711_v4, %v2223_v12  ;;  %v672_v20 = vpop.f32.mrb[21].mxu0  ;;  %v713_v21 = vpop.f32.mrb[21].mxu1 }
 0x21d   :  { %v719_v62 = vadd.f32 %v672_v20, %v2220_v11  ;;  %v721_v63 = vadd.f32 %v713_v21, %v2226_v14  ;;  %v674_v0 = vpop.f32.mrb[22].mxu0  ;;  %v715_v1 = vpop.f32.mrb[22].mxu1 }
 0x21e   :  { %v1604_v2 = vmul.f32 -1.442695, %v718_v5  ;;  %v675_v6 = vpop.f32.mrb[23].mxu0  ;;  %v716_v7 = vpop.f32.mrb[23].mxu1 }
 0x21f   :  { %v1605_v10 = vmul.f32 -1.442695, %v719_v62  ;;  %v1606_v9 = vmul.f32 -1.442695, %v721_v63 }
 0x220   :  { %1781 = vpow2.f32 %v1604_v2  ;;  %v2686_v2 = vld [vmem:[#allocation13_spill] sm:$0xff] }
 0x221   :  { %1783 = vpow2.f32 %v1605_v10 }
 0x222   :  { %1785 = vpow2.f32 %v1606_v9 }
 0x223   :  { %1787 = vtanh.f32 %v720_v13 }
 0x22a   :  { %v1782_v61 = vpop.eup %1781 }
 0x22b   :  { %v1784_v17 = vpop.eup %1783  ;;  %v725_v8 = vadd.f32 1.0, %v1782_v61 }
 0x22c   :  { %v731_v12 = vadd.f32 1.0, %v1784_v17  ;;  %v1786_v11 = vpop.eup %1785 }
 0x22d   :  { %1789 = vrcp.f32 %v725_v8  ;;  %v1788_v56 = vpop.eup %1787  ;;  %v738_v39 = vadd.f32 1.0, %v1786_v11 }
 0x22e   :  { %1791 = vrcp.f32 %v731_v12 }
 0x22f   :  { %1793 = vrcp.f32 %v738_v39 }
 0x237   :  { %v1790_v14 = vpop.eup %1789 }
 0x238   :  { %v1792_v3 = vpop.eup %1791  ;;  %v742_v30 = vmul.f32 %v1790_v14, %v1788_v56 }
 0x239   :  { %v741_v60 = vmul.f32 %v1792_v3, %v2299_v59  ;;  %v1794_v57 = vpop.eup %1793 }
 0x23b   :  { %v2341_v15 = vadd.f32 %v742_v30, %v741_v60 }
 0x23d   :  { %1795 = vtanh.f32 %v2341_v15 }
 0x247   :  { %v1796_v4 = vpop.eup %1795 }
 0x248   :  { %v745_v5 = vmul.f32 %v1796_v4, %v1794_v57 }
 0x24a   :  { %v751_v13 = vpack.c.bf16 %v745_v5, %v745_v5 }
 0x24c   :  { %785 = vmatmul.mubr.bf16.vlgmr.msra.gmra.mrb[24].mxu0 %v751_v13  ;;  %826 = vmatmul.mubr.bf16.vlgmr.msra.gmra.mrb[24].mxu1 %v751_v13 }
 0x24d   :  { %869 = vmatpush1.bf16.msra.mxu0 %v2045_v23  ;;  %910 = vmatpush1.bf16.msra.mxu1 %v2050_v25 }
 0x24e   :  { %870 = vmatprep.subr.bf16.mxu0 %v2048_v24  ;;  %911 = vmatprep.subr.bf16.mxu1 %v2054_v26 }
 0x24f   :  { %900 = vmatprep.mubr.bf16.mxu0 %v2685_v58  ;;  %941 = vmatprep.mubr.bf16.mxu1 %v2685_v58 }
 0x251   :  { %871 = vmatpush1.bf16.msra.mxu0 %v2057_v27  ;;  %912 = vmatpush1.bf16.msra.mxu1 %v2060_v28 }
 0x252   :  { %872 = vmatprep.subr.bf16.mxu0 %v2064_v29  ;;  %913 = vmatprep.subr.bf16.mxu1 %v2072_v31 }
 0x255   :  { %873 = vmatpush1.bf16.msra.mxu0 %v2075_v32  ;;  %914 = vmatpush1.bf16.msra.mxu1 %v2081_v34 }
 0x256   :  { %874 = vmatprep.subr.bf16.mxu0 %v2078_v33  ;;  %915 = vmatprep.subr.bf16.mxu1 %v2085_v35 }
 0x259   :  { %875 = vmatpush1.bf16.msra.mxu0 %v2088_v36  ;;  %916 = vmatpush1.bf16.msra.mxu1 %v2096_v38 }
 0x25a   :  { %876 = vmatprep.subr.bf16.mxu0 %v2093_v37  ;;  %917 = vmatprep.subr.bf16.mxu1 %v2103_v40 }
 0x25d   :  { %877 = vmatpush1.bf16.msra.mxu0 %v2106_v41  ;;  %918 = vmatpush1.bf16.msra.mxu1 %v2112_v43 }
 0x25e   :  { %878 = vmatprep.subr.bf16.mxu0 %v2109_v42  ;;  %919 = vmatprep.subr.bf16.mxu1 %v2116_v44 }
 0x261   :  { %879 = vmatpush1.bf16.msra.mxu0 %v2119_v45  ;;  %920 = vmatpush1.bf16.msra.mxu1 %v2127_v47 }
 0x262   :  { %880 = vmatprep.subr.bf16.mxu0 %v2124_v46  ;;  %921 = vmatprep.subr.bf16.mxu1 %v2134_v49 }
 0x265   :  { %881 = vmatpush1.bf16.msra.mxu0 %v2137_v50  ;;  %922 = vmatpush1.bf16.msra.mxu1 %v2143_v52 }
 0x266   :  { %882 = vmatprep.subr.bf16.mxu0 %v2140_v51  ;;  %923 = vmatprep.subr.bf16.mxu1 %v2147_v53 }
 0x269   :  { %883 = vmatpush1.bf16.msra.mxu0 %v2150_v54  ;;  %924 = vmatpush1.bf16.msra.mxu1 %v2156_v55 }
 0x26a   :  { %984 = vmatprep.subr.bf16.mxu0 %v2038_v18  ;;  %1025 = vmatprep.subr.bf16.mxu1 %v2043_v22 }
 0x31f   :  { %v786_v59 = vpop.f32.mrb[24].mxu0  ;;  %v827_v20 = vpop.f32.mrb[24].mxu1 }
 0x320   :  { %v834_v21 = vadd.f32 %v786_v59, %v2229_v16  ;;  %v836_v62 = vadd.f32 %v827_v20, %v2237_v48  ;;  %v788_v63 = vpop.f32.mrb[25].mxu0  ;;  %v829_v0 = vpop.f32.mrb[25].mxu1 }
 0x321   :  { %v835_v1 = vadd.f32 %v788_v63, %v2231_v19  ;;  %v837_v6 = vadd.f32 %v829_v0, %v2686_v2  ;;  %v790_v7 = vpop.f32.mrb[26].mxu0  ;;  %v831_v10 = vpop.f32.mrb[26].mxu1  ;;  %v2688_v0 = vld [vmem:[#allocation14_spill] sm:$0xff] }
 0x322   :  { %v1607_v9 = vmul.f32 -1.442695, %v834_v21  ;;  %v791_v61 = vpop.f32.mrb[27].mxu0  ;;  %v832_v17 = vpop.f32.mrb[27].mxu1  ;;  %v2689_v7 = vld [vmem:[#allocation12_spill] sm:$0xff] }
 0x323   :  { %v1608_v8 = vmul.f32 -1.442695, %v835_v1  ;;  %v1609_v12 = vmul.f32 -1.442695, %v837_v6 }
 0x324   :  { %1797 = vpow2.f32 %v1607_v9  ;;  %v2690_v9 = vld [vmem:[#allocation15_spill] sm:$0xff] }
 0x325   :  { %1799 = vpow2.f32 %v1608_v8 }
 0x326   :  { %1801 = vpow2.f32 %v1609_v12 }
 0x327   :  { %1803 = vtanh.f32 %v836_v62  ;;  %v2687_v62 = vld [vmem:[#allocation11_spill] sm:$0xff] }
 0x32e   :  { %v1798_v11 = vpop.eup %1797 }
 0x32f   :  { %v1800_v56 = vpop.eup %1799  ;;  %v841_v16 = vadd.f32 1.0, %v1798_v11 }
 0x330   :  { %v847_v48 = vadd.f32 1.0, %v1800_v56  ;;  %v1802_v19 = vpop.eup %1801 }
 0x331   :  { %1805 = vrcp.f32 %v841_v16  ;;  %v1804_v14 = vpop.eup %1803  ;;  %v854_v60 = vadd.f32 1.0, %v1802_v19 }
 0x332   :  { %1807 = vrcp.f32 %v847_v48 }
 0x333   :  { %1809 = vrcp.f32 %v854_v60 }
 0x33b   :  { %v1806_v3 = vpop.eup %1805 }
 0x33c   :  { %v1808_v30 = vpop.eup %1807  ;;  %v858_v39 = vmul.f32 %v1806_v3, %v1804_v14 }
 0x33d   :  { %v857_v57 = vmul.f32 %v1808_v30, %v2341_v15  ;;  %v1810_v5 = vpop.eup %1809 }
 0x33f   :  { %v2383_v4 = vadd.f32 %v858_v39, %v857_v57 }
 0x341   :  { %1811 = vtanh.f32 %v2383_v4 }
 0x34b   :  { %v1812_v13 = vpop.eup %1811 }
 0x34c   :  { %v861_v59 = vmul.f32 %v1812_v13, %v1810_v5 }
 0x34e   :  { %v867_v20 = vpack.c.bf16 %v861_v59, %v861_v59 }
 0x350   :  { %901 = vmatmul.mubr.bf16.vlgmr.msra.gmra.mrb[28].mxu0 %v867_v20  ;;  %942 = vmatmul.mubr.bf16.vlgmr.msra.gmra.mrb[28].mxu1 %v867_v20 }
 0x351   :  { %985 = vmatpush1.bf16.msra.mxu0 %v2045_v23  ;;  %1026 = vmatpush1.bf16.msra.mxu1 %v2050_v25 }
 0x352   :  { %986 = vmatprep.subr.bf16.mxu0 %v2048_v24  ;;  %1027 = vmatprep.subr.bf16.mxu1 %v2054_v26 }
 0x353   :  { %1016 = vmatprep.mubr.bf16.mxu0 %v2685_v58  ;;  %1057 = vmatprep.mubr.bf16.mxu1 %v2685_v58 }
 0x355   :  { %987 = vmatpush1.bf16.msra.mxu0 %v2057_v27  ;;  %1028 = vmatpush1.bf16.msra.mxu1 %v2060_v28 }
 0x356   :  { %988 = vmatprep.subr.bf16.mxu0 %v2064_v29  ;;  %1029 = vmatprep.subr.bf16.mxu1 %v2072_v31 }
 0x359   :  { %989 = vmatpush1.bf16.msra.mxu0 %v2075_v32  ;;  %1030 = vmatpush1.bf16.msra.mxu1 %v2081_v34 }
 0x35a   :  { %990 = vmatprep.subr.bf16.mxu0 %v2078_v33  ;;  %1031 = vmatprep.subr.bf16.mxu1 %v2085_v35 }
 0x35d   :  { %991 = vmatpush1.bf16.msra.mxu0 %v2088_v36  ;;  %1032 = vmatpush1.bf16.msra.mxu1 %v2096_v38 }
 0x35e   :  { %992 = vmatprep.subr.bf16.mxu0 %v2093_v37  ;;  %1033 = vmatprep.subr.bf16.mxu1 %v2103_v40 }
 0x361   :  { %993 = vmatpush1.bf16.msra.mxu0 %v2106_v41  ;;  %1034 = vmatpush1.bf16.msra.mxu1 %v2112_v43 }
 0x362   :  { %994 = vmatprep.subr.bf16.mxu0 %v2109_v42  ;;  %1035 = vmatprep.subr.bf16.mxu1 %v2116_v44 }
 0x365   :  { %995 = vmatpush1.bf16.msra.mxu0 %v2119_v45  ;;  %1036 = vmatpush1.bf16.msra.mxu1 %v2127_v47 }
 0x366   :  { %996 = vmatprep.subr.bf16.mxu0 %v2124_v46  ;;  %1037 = vmatprep.subr.bf16.mxu1 %v2134_v49 }
 0x369   :  { %997 = vmatpush1.bf16.msra.mxu0 %v2137_v50  ;;  %1038 = vmatpush1.bf16.msra.mxu1 %v2143_v52 }
 0x36a   :  { %998 = vmatprep.subr.bf16.mxu0 %v2140_v51  ;;  %1039 = vmatprep.subr.bf16.mxu1 %v2147_v53 }
 0x36d   :  { %999 = vmatpush1.bf16.msra.mxu0 %v2150_v54  ;;  %1040 = vmatpush1.bf16.msra.mxu1 %v2156_v55 }
 0x36e   :  { %1100 = vmatprep.subr.bf16.mxu0 %v2038_v18  ;;  %1141 = vmatprep.subr.bf16.mxu1 %v2043_v22 }
 0x423   :  { %v902_v15 = vpop.f32.mrb[28].mxu0  ;;  %v943_v21 = vpop.f32.mrb[28].mxu1 }
 0x424   :  { %v950_v63 = vadd.f32 %v902_v15, %v2687_v62  ;;  %v952_v1 = vadd.f32 %v943_v21, %v2688_v0  ;;  %v904_v2 = vpop.f32.mrb[29].mxu0  ;;  %v945_v6 = vpop.f32.mrb[29].mxu1 }
 0x425   :  { %v951_v10 = vadd.f32 %v904_v2, %v2689_v7  ;;  %v953_v61 = vadd.f32 %v945_v6, %v2690_v9  ;;  %v906_v17 = vpop.f32.mrb[30].mxu0  ;;  %v947_v8 = vpop.f32.mrb[30].mxu1 }
 0x426   :  { %v1610_v12 = vmul.f32 -1.442695, %v950_v63  ;;  %v907_v11 = vpop.f32.mrb[31].mxu0  ;;  %v948_v56 = vpop.f32.mrb[31].mxu1 }
 0x427   :  { %v1611_v18 = vmul.f32 -1.442695, %v951_v10  ;;  %v1612_v22 = vmul.f32 -1.442695, %v953_v61 }
 0x428   :  { %1813 = vpow2.f32 %v1610_v12 }
 0x429   :  { %1815 = vpow2.f32 %v1611_v18 }
 0x42a   :  { %1817 = vpow2.f32 %v1612_v22 }
 0x42b   :  { %1819 = vtanh.f32 %v952_v1 }
 0x432   :  { %v1814_v16 = vpop.eup %1813 }
 0x433   :  { %v1816_v48 = vpop.eup %1815  ;;  %v957_v19 = vadd.f32 1.0, %v1814_v16 }
 0x434   :  { %v963_v14 = vadd.f32 1.0, %v1816_v48  ;;  %v1818_v3 = vpop.eup %1817 }
 0x435   :  { %1821 = vrcp.f32 %v957_v19  ;;  %v1820_v30 = vpop.eup %1819  ;;  %v970_v5 = vadd.f32 1.0, %v1818_v3  ;;  %v2477_v3 = vld [vmem:[#allocation5 + $0x8] ss:$16 sps:$4 sm:$0xff]  }
 0x436   :  { %1823 = vrcp.f32 %v963_v14  ;;  %v2474_v14 = vld [vmem:[#allocation5] ss:$16 sps:$4 sm:$0xff]  }
 0x437   :  { %1825 = vrcp.f32 %v970_v5  ;;  %v2494_v5 = vld [vmem:[#allocation5 + $0x44] ss:$16 sps:$4 sm:$0xff]  }
 0x43f   :  { %v1822_v39 = vpop.eup %1821 }
 0x440   :  { %v1824_v60 = vpop.eup %1823  ;;  %v974_v57 = vmul.f32 %v1822_v39, %v1820_v30  ;;  %v2480_v30 = vld [vmem:[#allocation5 + $0x24] ss:$16 sps:$4 sm:$0xff]   ;;  %v2483_v39 = vld [vmem:[#allocation5 + $0x2c] ss:$16 sps:$4 sm:$0xff]  }
 0x441   :  { %v973_v13 = vmul.f32 %v1824_v60, %v2383_v4  ;;  %v1826_v20 = vpop.eup %1825  ;;  %v2488_v60 = vld [vmem:[#allocation5 + $0x20] ss:$16 sps:$4 sm:$0xff]  }
 0x443   :  { %v2425_v59 = vadd.f32 %v974_v57, %v973_v13  ;;  %v2491_v57 = vld [vmem:[#allocation5 + $0x28] ss:$16 sps:$4 sm:$0xff]   ;;  %v2497_v13 = vld [vmem:[#allocation5 + $0x4c] ss:$16 sps:$4 sm:$0xff]  }
 0x445   :  { %1827 = vtanh.f32 %v2425_v59 }
 0x44f   :  { %v1828_v15 = vpop.eup %1827 }
 0x450   :  { %v977_v21 = vmul.f32 %v1828_v15, %v1826_v20  ;;  %v2503_v20 = vld [vmem:[#allocation5 + $0x48] ss:$16 sps:$4 sm:$0xff]   ;;  %v2506_v15 = vld [vmem:[#allocation5 + $0x64] ss:$16 sps:$4 sm:$0xff]  }
 0x452   :  { %v983_v62 = vpack.c.bf16 %v977_v21, %v977_v21  ;;  %v2509_v21 = vld [vmem:[#allocation5 + $0x6c] ss:$16 sps:$4 sm:$0xff]  }
 0x454   :  { %1017 = vmatmul.mubr.bf16.vlgmr.msra.gmra.mrb[32].mxu0 %v983_v62  ;;  %1058 = vmatmul.mubr.bf16.vlgmr.msra.gmra.mrb[32].mxu1 %v983_v62  ;;  %v2512_v62 = vld [vmem:[#allocation5 + $0x60] ss:$16 sps:$4 sm:$0xff]  }
 0x455   :  { %1101 = vmatpush1.bf16.msra.mxu0 %v2045_v23  ;;  %1142 = vmatpush1.bf16.msra.mxu1 %v2050_v25  ;;  %v2460_v23 = vld [vmem:[#allocation5 + $0x4] ss:$16 sps:$4 sm:$0xff]  }
 0x456   :  { %1102 = vmatprep.subr.bf16.mxu0 %v2048_v24  ;;  %1143 = vmatprep.subr.bf16.mxu1 %v2054_v26  ;;  %v2463_v24 = vld [vmem:[#allocation5 + $0xc] ss:$16 sps:$4 sm:$0xff]  }
 0x457   :  { %1132 = vmatprep.mubr.bf16.mxu0 %v2685_v58  ;;  %1173 = vmatprep.mubr.bf16.mxu1 %v2685_v58 }
 0x459   :  { %1103 = vmatpush1.bf16.msra.mxu0 %v2057_v27  ;;  %1144 = vmatpush1.bf16.msra.mxu1 %v2060_v28  ;;  %v2691_v27 = vld [vmem:[#allocation16_spill] sm:$0xff] }
 0x45a   :  { %1104 = vmatprep.subr.bf16.mxu0 %v2064_v29  ;;  %1145 = vmatprep.subr.bf16.mxu1 %v2072_v31  ;;  %v2692_v29 = vld [vmem:[#allocation19_spill] sm:$0xff] }
 0x45d   :  { %1105 = vmatpush1.bf16.msra.mxu0 %v2075_v32  ;;  %1146 = vmatpush1.bf16.msra.mxu1 %v2081_v34  ;;  %v2693_v34 = vld [vmem:[#allocation17_spill] sm:$0xff] }
 0x45e   :  { %1106 = vmatprep.subr.bf16.mxu0 %v2078_v33  ;;  %1147 = vmatprep.subr.bf16.mxu1 %v2085_v35 }
 0x461   :  { %1107 = vmatpush1.bf16.msra.mxu0 %v2088_v36  ;;  %1148 = vmatpush1.bf16.msra.mxu1 %v2096_v38  ;;  %v2694_v36 = vld [vmem:[#allocation21_spill] sm:$0xff] }
 0x462   :  { %1108 = vmatprep.subr.bf16.mxu0 %v2093_v37  ;;  %1149 = vmatprep.subr.bf16.mxu1 %v2103_v40 }
 0x465   :  { %1109 = vmatpush1.bf16.msra.mxu0 %v2106_v41  ;;  %1150 = vmatpush1.bf16.msra.mxu1 %v2112_v43 }
 0x466   :  { %1110 = vmatprep.subr.bf16.mxu0 %v2109_v42  ;;  %1151 = vmatprep.subr.bf16.mxu1 %v2116_v44 }
 0x469   :  { %1111 = vmatpush1.bf16.msra.mxu0 %v2119_v45  ;;  %1152 = vmatpush1.bf16.msra.mxu1 %v2127_v47 }
 0x46a   :  { %1112 = vmatprep.subr.bf16.mxu0 %v2124_v46  ;;  %1153 = vmatprep.subr.bf16.mxu1 %v2134_v49 }
 0x46d   :  { %1113 = vmatpush1.bf16.msra.mxu0 %v2137_v50  ;;  %1154 = vmatpush1.bf16.msra.mxu1 %v2143_v52 }
 0x46e   :  { %1114 = vmatprep.subr.bf16.mxu0 %v2140_v51  ;;  %1155 = vmatprep.subr.bf16.mxu1 %v2147_v53 }
 0x471   :  { %1115 = vmatpush1.bf16.msra.mxu0 %v2150_v54  ;;  %1156 = vmatpush1.bf16.msra.mxu1 %v2156_v55 }
 0x472   :  { %1216 = vmatprep.subr.bf16.mxu0 %v2460_v23  ;;  %1257 = vmatprep.subr.bf16.mxu1 %v2463_v24 }
 0x527   :  { %v1018_v25 = vpop.f32.mrb[32].mxu0  ;;  %v1059_v26 = vpop.f32.mrb[32].mxu1 }
 0x528   :  { %v1066_v28 = vadd.f32 %v1018_v25, %v2691_v27  ;;  %v1068_v31 = vadd.f32 %v1059_v26, %v2692_v29  ;;  %v1020_v32 = vpop.f32.mrb[33].mxu0  ;;  %v1061_v33 = vpop.f32.mrb[33].mxu1  ;;  %v2515_v25 = vld [vmem:[#allocation5 + $0x68] ss:$16 sps:$4 sm:$0xff]   ;;  %v2518_v26 = vld [vmem:[#allocation5 + $0x84] ss:$16 sps:$4 sm:$0xff]  }
 0x529   :  { %v1067_v35 = vadd.f32 %v1020_v32, %v2693_v34  ;;  %v1069_v37 = vadd.f32 %v1061_v33, %v2694_v36  ;;  %v1022_v38 = vpop.f32.mrb[34].mxu0  ;;  %v1063_v40 = vpop.f32.mrb[34].mxu1  ;;  %v2521_v27 = vld [vmem:[#allocation5 + $0x8c] ss:$16 sps:$4 sm:$0xff]  }
 0x52a   :  { %v1613_v41 = vmul.f32 -1.442695, %v1066_v28  ;;  %v1023_v4 = vpop.f32.mrb[35].mxu0  ;;  %v1064_v63 = vpop.f32.mrb[35].mxu1  ;;  %v2524_v28 = vld [vmem:[#allocation5 + $0x80] ss:$16 sps:$4 sm:$0xff]  }
 0x52b   :  { %v1614_v0 = vmul.f32 -1.442695, %v1067_v35  ;;  %v1615_v1 = vmul.f32 -1.442695, %v1069_v37  ;;  %v2698_v29 = vld [vmem:[#allocation23_spill] sm:$0xff] }
 0x52c   :  { %1829 = vpow2.f32 %v1613_v41 }
 0x52d   :  { %1831 = vpow2.f32 %v1614_v0 }
 0x52e   :  { %1833 = vpow2.f32 %v1615_v1 }
 0x52f   :  { %1835 = vtanh.f32 %v1068_v31 }
 0x536   :  { %v1830_v2 = vpop.eup %1829 }
 0x537   :  { %v1832_v6 = vpop.eup %1831  ;;  %v1073_v7 = vadd.f32 1.0, %v1830_v2 }
 0x538   :  { %v1079_v10 = vadd.f32 1.0, %v1832_v6  ;;  %v1834_v9 = vpop.eup %1833 }
 0x539   :  { %1837 = vrcp.f32 %v1073_v7  ;;  %v1836_v61 = vpop.eup %1835  ;;  %v1086_v11 = vadd.f32 1.0, %v1834_v9 }
 0x53a   :  { %1839 = vrcp.f32 %v1079_v10 }
 0x53b   :  { %1841 = vrcp.f32 %v1086_v11  ;;  %v1917_v11 = vld [vmem:[#allocation5 + $0xc4] ss:$16 sps:$4 sm:$0xff]  }
 0x543   :  { %v1838_v17 = vpop.eup %1837 }
 0x544   :  { %v1840_v8 = vpop.eup %1839  ;;  %v1090_v12 = vmul.f32 %v1838_v17, %v1836_v61  ;;  %v1913_v61 = vld [vmem:[#allocation5 + $0xa4] ss:$16 sps:$4 sm:$0xff]   ;;  %v1914_v17 = vld [vmem:[#allocation5 + $0xac] ss:$16 sps:$4 sm:$0xff]  }
 0x545   :  { %v1089_v56 = vmul.f32 %v1840_v8, %v2425_v59  ;;  %v1842_v22 = vpop.eup %1841  ;;  %v2500_v59 = vld [vmem:[#allocation5 + $0x40] ss:$16 sps:$4 sm:$0xff]  }
 0x546   :  { %v1915_v8 = vld [vmem:[#allocation5 + $0xa0] ss:$16 sps:$4 sm:$0xff]  }
 0x547   :  { %v2471_v18 = vadd.f32 %v1090_v12, %v1089_v56  ;;  %v1916_v12 = vld [vmem:[#allocation5 + $0xa8] ss:$16 sps:$4 sm:$0xff]   ;;  %v1918_v56 = vld [vmem:[#allocation5 + $0xcc] ss:$16 sps:$4 sm:$0xff]  }
 0x549   :  { %1843 = vtanh.f32 %v2471_v18 }
 0x553   :  { %v1844_v16 = vpop.eup %1843 }
 0x554   :  { %v1093_v48 = vmul.f32 %v1844_v16, %v1842_v22  ;;  %v1920_v22 = vld [vmem:[#allocation5 + $0xc8] ss:$16 sps:$4 sm:$0xff]   ;;  %v1921_v16 = vld [vmem:[#allocation5 + $0xe4] ss:$16 sps:$4 sm:$0xff]  }
 0x556   :  { %v1099_v19 = vpack.c.bf16 %v1093_v48, %v1093_v48  ;;  %v1922_v48 = vld [vmem:[#allocation5 + $0xec] ss:$16 sps:$4 sm:$0xff]  }
 0x558   :  { %1133 = vmatmul.mubr.bf16.vlgmr.msra.gmra.mrb[36].mxu0 %v1099_v19  ;;  %1174 = vmatmul.mubr.bf16.vlgmr.msra.gmra.mrb[36].mxu1 %v1099_v19  ;;  %v1923_v19 = vld [vmem:[#allocation5 + $0xe0] ss:$16 sps:$4 sm:$0xff]  }
 0x559   :  { %1217 = vmatpush1.bf16.msra.mxu0 %v2474_v14  ;;  %1258 = vmatpush1.bf16.msra.mxu1 %v2477_v3 }
 0x55a   :  { %1218 = vmatprep.subr.bf16.mxu0 %v2480_v30  ;;  %1259 = vmatprep.subr.bf16.mxu1 %v2483_v39 }
 0x55b   :  { %1248 = vmatprep.mubr.bf16.mxu0 %v2685_v58  ;;  %1289 = vmatprep.mubr.bf16.mxu1 %v2685_v58 }
 0x55d   :  { %1219 = vmatpush1.bf16.msra.mxu0 %v2488_v60  ;;  %1260 = vmatpush1.bf16.msra.mxu1 %v2491_v57 }
 0x55e   :  { %1220 = vmatprep.subr.bf16.mxu0 %v2494_v5  ;;  %1261 = vmatprep.subr.bf16.mxu1 %v2497_v13 }
 0x561   :  { %1221 = vmatpush1.bf16.msra.mxu0 %v2500_v59  ;;  %1262 = vmatpush1.bf16.msra.mxu1 %v2503_v20 }
 0x562   :  { %1222 = vmatprep.subr.bf16.mxu0 %v2506_v15  ;;  %1263 = vmatprep.subr.bf16.mxu1 %v2509_v21 }
 0x565   :  { %1223 = vmatpush1.bf16.msra.mxu0 %v2512_v62  ;;  %1264 = vmatpush1.bf16.msra.mxu1 %v2515_v25 }
 0x566   :  { %1224 = vmatprep.subr.bf16.mxu0 %v2518_v26  ;;  %1265 = vmatprep.subr.bf16.mxu1 %v2521_v27 }
 0x569   :  { %1225 = vmatpush1.bf16.msra.mxu0 %v2524_v28  ;;  %1266 = vmatpush1.bf16.msra.mxu1 %v2112_v43 }
 0x56a   :  { %1226 = vmatprep.subr.bf16.mxu0 %v2109_v42  ;;  %1267 = vmatprep.subr.bf16.mxu1 %v2116_v44  ;;  %v2695_v44 = vld [vmem:[#allocation18_spill] sm:$0xff] }
 0x56d   :  { %1227 = vmatpush1.bf16.msra.mxu0 %v2119_v45  ;;  %1268 = vmatpush1.bf16.msra.mxu1 %v2127_v47 }
 0x56e   :  { %1228 = vmatprep.subr.bf16.mxu0 %v2124_v46  ;;  %1269 = vmatprep.subr.bf16.mxu1 %v2134_v49  ;;  %v2696_v46 = vld [vmem:[#allocation22_spill] sm:$0xff] }
 0x571   :  { %1229 = vmatpush1.bf16.msra.mxu0 %v2137_v50  ;;  %1270 = vmatpush1.bf16.msra.mxu1 %v2143_v52  ;;  %v2697_v52 = vld [vmem:[#allocation20_spill] sm:$0xff] }
 0x572   :  { %1230 = vmatprep.subr.bf16.mxu0 %v2140_v51  ;;  %1271 = vmatprep.subr.bf16.mxu1 %v2147_v53 }
 0x575   :  { %1231 = vmatpush1.bf16.msra.mxu0 %v2150_v54  ;;  %1272 = vmatpush1.bf16.msra.mxu1 %v2156_v55 }
 0x576   :  { %1332 = vmatprep.subr.bf16.mxu0 %v2460_v23  ;;  %1373 = vmatprep.subr.bf16.mxu1 %v2463_v24 }
 0x62b   :  { %v1134_v42 = vpop.f32.mrb[36].mxu0  ;;  %v1175_v43 = vpop.f32.mrb[36].mxu1 }
 0x62c   :  { %v1182_v45 = vadd.f32 %v1134_v42, %v2695_v44  ;;  %v1184_v47 = vadd.f32 %v1175_v43, %v2696_v46  ;;  %v1136_v49 = vpop.f32.mrb[37].mxu0  ;;  %v1177_v50 = vpop.f32.mrb[37].mxu1 }
 0x62d   :  { %v1183_v51 = vadd.f32 %v1136_v49, %v2697_v52  ;;  %v1185_v53 = vadd.f32 %v1177_v50, %v2698_v29  ;;  %v1138_v31 = vpop.f32.mrb[38].mxu0  ;;  %v1179_v54 = vpop.f32.mrb[38].mxu1 }
 0x62e   :  { %v1616_v32 = vmul.f32 -1.442695, %v1182_v45  ;;  %v1139_v55 = vpop.f32.mrb[39].mxu0  ;;  %v1180_v33 = vpop.f32.mrb[39].mxu1 }
 0x62f   :  { %v1617_v23 = vmul.f32 -1.442695, %v1183_v51  ;;  %v1618_v24 = vmul.f32 -1.442695, %v1185_v53 }
 0x630   :  { %1845 = vpow2.f32 %v1616_v32 }
 0x631   :  { %1847 = vpow2.f32 %v1617_v23 }
 0x632   :  { %1849 = vpow2.f32 %v1618_v24 }
 0x633   :  { %1851 = vtanh.f32 %v1184_v47 }
 0x63a   :  { %v1846_v34 = vpop.eup %1845 }
 0x63b   :  { %v1848_v35 = vpop.eup %1847  ;;  %v1189_v36 = vadd.f32 1.0, %v1846_v34 }
 0x63c   :  { %v1195_v37 = vadd.f32 1.0, %v1848_v35  ;;  %v1850_v38 = vpop.eup %1849  ;;  %v1447_v35 = vld [vmem:[%s2657_s4] sm:$0xff] }
 0x63d   :  { %1853 = vrcp.f32 %v1189_v36  ;;  %v1852_v40 = vpop.eup %1851  ;;  %v1202_v0 = vadd.f32 1.0, %v1850_v38  ;;  %v1448_v36 = vld [vmem:[%s2657_s4 + $0x8] sm:$0xff]  ;;  %v1449_v38 = vld [vmem:[%s2657_s4 + $0x10] sm:$0xff] }
 0x63e   :  { %1855 = vrcp.f32 %v1195_v37  ;;  %v1679_v37 = vpack.c.bf16 %v1448_v36, %v1447_v35 }
 0x63f   :  { %1857 = vrcp.f32 %v1202_v0 }
 0x647   :  { %v1854_v41 = vpop.eup %1853 }
 0x648   :  { %v1856_v4 = vpop.eup %1855  ;;  %v1206_v63 = vmul.f32 %v1854_v41, %v1852_v40  ;;  %v1450_v40 = vld [vmem:[%s2657_s4 + $0x18] sm:$0xff] }
 0x649   :  { %v1205_v1 = vmul.f32 %v1856_v4, %v2471_v18  ;;  %v1858_v6 = vpop.eup %1857  ;;  %v1919_v18 = vld [vmem:[#allocation5 + $0xc0] ss:$16 sps:$4 sm:$0xff]   ;;  %v1682_v41 = vpack.c.bf16 %v1450_v40, %v1449_v38 }
 0x64a   :  { %v1451_v4 = vld [vmem:[%s2657_s4 + $0x20] sm:$0xff] }
 0x64b   :  { %v2547_v2 = vadd.f32 %v1206_v63, %v1205_v1  ;;  %v1452_v63 = vld [vmem:[%s2657_s4 + $0x28] sm:$0xff]  ;;  %v1453_v1 = vld [vmem:[%s2657_s4 + $0x30] sm:$0xff] }
 0x64c   :  { %v1685_v0 = vpack.c.bf16 %v1452_v63, %v1451_v4 }
 0x64d   :  { %1859 = vtanh.f32 %v2547_v2 }
 0x657   :  { %v1860_v7 = vpop.eup %1859 }
 0x658   :  { %v1209_v10 = vmul.f32 %v1860_v7, %v1858_v6  ;;  %v1455_v7 = vld [vmem:[%s2657_s4 + $0x40] sm:$0xff] }
 0x65a   :  { %v1215_v9 = vpack.c.bf16 %v1209_v10, %v1209_v10  ;;  %v1456_v10 = vld [vmem:[%s2657_s4 + $0x48] sm:$0xff] }
 0x65c   :  { %1249 = vmatmul.mubr.bf16.vlgmr.msra.gmra.mrb[40].mxu0 %v1215_v9  ;;  %1290 = vmatmul.mubr.bf16.vlgmr.msra.gmra.mrb[40].mxu1 %v1215_v9  ;;  %v1691_v9 = vpack.c.bf16 %v1456_v10, %v1455_v7 }
 0x65d   :  { %1333 = vmatpush1.bf16.msra.mxu0 %v2474_v14  ;;  %1374 = vmatpush1.bf16.msra.mxu1 %v2477_v3  ;;  %v1924_v14 = vld [vmem:[#allocation5 + $0xe8] ss:$16 sps:$4 sm:$0xff]   ;;  %v2699_v3 = vmov 0.0|0.0  }
 0x65e   :  { %1334 = vmatprep.subr.bf16.mxu0 %v2480_v30  ;;  %1375 = vmatprep.subr.bf16.mxu1 %v2483_v39 }
 0x65f   :  { %1364 = vmatprep.mubr.bf16.mxu0 %v2685_v58  ;;  %1405 = vmatprep.mubr.bf16.mxu1 %v2685_v58  ;;  %v1912_v58 = vld [vmem:[#allocation5 + $0x88] ss:$16 sps:$4 sm:$0xff]  }
 0x661   :  { %1335 = vmatpush1.bf16.msra.mxu0 %v2488_v60  ;;  %1376 = vmatpush1.bf16.msra.mxu1 %v2491_v57  ;;  %v2700_v60 = vld [vmem:[#allocation24_spill] sm:$0xff] }
 0x662   :  { %1336 = vmatprep.subr.bf16.mxu0 %v2494_v5  ;;  %1377 = vmatprep.subr.bf16.mxu1 %v2497_v13  ;;  %v2701_v5 = vld [vmem:[#allocation27_spill] sm:$0xff] }
 0x665   :  { %1337 = vmatpush1.bf16.msra.mxu0 %v2500_v59  ;;  %1378 = vmatpush1.bf16.msra.mxu1 %v2503_v20 }
 0x666   :  { %1338 = vmatprep.subr.bf16.mxu0 %v2506_v15  ;;  %1379 = vmatprep.subr.bf16.mxu1 %v2509_v21  ;;  %v2702_v15 = vld [vmem:[#allocation25_spill] sm:$0xff] }
 0x669   :  { %1339 = vmatpush1.bf16.msra.mxu0 %v2512_v62  ;;  %1380 = vmatpush1.bf16.msra.mxu1 %v2515_v25  ;;  %v2703_v62 = vld [vmem:[#allocation29_spill] sm:$0xff] }
 0x66a   :  { %1340 = vmatprep.subr.bf16.mxu0 %v2518_v26  ;;  %1381 = vmatprep.subr.bf16.mxu1 %v2521_v27 }
 0x66d   :  { %1341 = vmatpush1.bf16.msra.mxu0 %v2524_v28  ;;  %1382 = vmatpush1.bf16.msra.mxu1 %v1912_v58  ;;  %v1457_v58 = vld [vmem:[%s2657_s4 + $0x50] sm:$0xff] }
 0x66e   :  { %1342 = vmatprep.subr.bf16.mxu0 %v1913_v61  ;;  %1383 = vmatprep.subr.bf16.mxu1 %v1914_v17  ;;  %v1458_v61 = vld [vmem:[%s2657_s4 + $0x58] sm:$0xff] }
 0x66f   :  { %v1694_v17 = vpack.c.bf16 %v1458_v61, %v1457_v58 }
 0x671   :  { %1343 = vmatpush1.bf16.msra.mxu0 %v1915_v8  ;;  %1384 = vmatpush1.bf16.msra.mxu1 %v1916_v12  ;;  %v1459_v8 = vld [vmem:[%s2657_s4 + $0x60] sm:$0xff]  ;;  %v1460_v12 = vld [vmem:[%s2657_s4 + $0x68] sm:$0xff] }
 0x672   :  { %1344 = vmatprep.subr.bf16.mxu0 %v1917_v11  ;;  %1385 = vmatprep.subr.bf16.mxu1 %v1918_v56  ;;  %v1981_v11 = vmov 0.0   ;;  %v1697_v56 = vpack.c.bf16 %v1460_v12, %v1459_v8 }
 0x675   :  { %1345 = vmatpush1.bf16.msra.mxu0 %v1919_v18  ;;  %1386 = vmatpush1.bf16.msra.mxu1 %v1920_v22  ;;  %v1461_v18 = vld [vmem:[%s2657_s4 + $0x70] sm:$0xff]  ;;  %v1462_v22 = vld [vmem:[%s2657_s4 + $0x78] sm:$0xff] }
 0x676   :  { %1346 = vmatprep.subr.bf16.mxu0 %v1921_v16  ;;  %1387 = vmatprep.subr.bf16.mxu1 %v1922_v48  ;;  %v1700_v16 = vpack.c.bf16 %v1462_v22, %v1461_v18 }
 0x679   :  { %1347 = vmatpush1.bf16.msra.mxu0 %v1923_v19  ;;  %1388 = vmatpush1.bf16.msra.mxu1 %v1924_v14  ;;  %v2704_v14 = vld [vmem:[#allocation26_spill] sm:$0xff] }
 0x67a   :  { %1678 = vmatprep.subr.bf16.mxu0 %v2699_v3 }
 0x72f   :  { %v1250_v30 = vpop.f32.mrb[40].mxu0  ;;  %v1291_v39 = vpop.f32.mrb[40].mxu1 }
 0x730   :  { %v1298_v57 = vadd.f32 %v1250_v30, %v2700_v60  ;;  %v1300_v13 = vadd.f32 %v1291_v39, %v2701_v5  ;;  %v1252_v59 = vpop.f32.mrb[41].mxu0  ;;  %v1293_v20 = vpop.f32.mrb[41].mxu1  ;;  %v2705_v39 = vld [vmem:[#allocation30_spill] sm:$0xff] }
 0x731   :  { %v1299_v21 = vadd.f32 %v1252_v59, %v2702_v15  ;;  %v1301_v25 = vadd.f32 %v1293_v20, %v2703_v62  ;;  %v1254_v26 = vpop.f32.mrb[42].mxu0  ;;  %v1295_v27 = vpop.f32.mrb[42].mxu1  ;;  %v2707_v20 = vld [vmem:[#allocation31_spill] sm:$0xff] }
 0x732   :  { %v1619_v28 = vmul.f32 -1.442695, %v1298_v57  ;;  %v1255_v42 = vpop.f32.mrb[43].mxu0  ;;  %v1296_v43 = vpop.f32.mrb[43].mxu1 }
 0x733   :  { %v1620_v44 = vmul.f32 -1.442695, %v1299_v21  ;;  %v1621_v45 = vmul.f32 -1.442695, %v1301_v25 }
 0x734   :  { %1861 = vpow2.f32 %v1619_v28 }
 0x735   :  { %1863 = vpow2.f32 %v1620_v44 }
 0x736   :  { %1865 = vpow2.f32 %v1621_v45 }
 0x737   :  { %1867 = vtanh.f32 %v1300_v13  ;;  %v2706_v13 = vld [vmem:[#allocation28_spill] sm:$0xff] }
 0x73e   :  { %v1862_v46 = vpop.eup %1861 }
 0x73f   :  { %v1864_v47 = vpop.eup %1863  ;;  %v1305_v49 = vadd.f32 1.0, %v1862_v46 }
 0x740   :  { %v1311_v50 = vadd.f32 1.0, %v1864_v47  ;;  %v1866_v52 = vpop.eup %1865 }
 0x741   :  { %1869 = vrcp.f32 %v1305_v49  ;;  %v1868_v51 = vpop.eup %1867  ;;  %v1318_v54 = vadd.f32 1.0, %v1866_v52 }
 0x742   :  { %1871 = vrcp.f32 %v1311_v50 }
 0x743   :  { %1873 = vrcp.f32 %v1318_v54 }
 0x74b   :  { %v1870_v29 = vpop.eup %1869 }
 0x74c   :  { %v1872_v53 = vpop.eup %1871  ;;  %v1322_v31 = vmul.f32 %v1870_v29, %v1868_v51 }
 0x74d   :  { %v1321_v32 = vmul.f32 %v1872_v53, %v2547_v2  ;;  %v1874_v33 = vpop.eup %1873  ;;  %v1454_v2 = vld [vmem:[%s2657_s4 + $0x38] sm:$0xff] }
 0x74e   :  { %v1688_v6 = vpack.c.bf16 %v1454_v2, %v1453_v1 }
 0x74f   :  { %v2575_v55 = vadd.f32 %v1322_v31, %v1321_v32 }
 0x751   :  { %1875 = vtanh.f32 %v2575_v55 }
 0x75b   :  { %v1876_v23 = vpop.eup %1875 }
 0x75c   :  { %v1325_v24 = vmul.f32 %v1876_v23, %v1874_v33  ;;  %v1625_v33 = vld [vmem:[%s2658_s5] ss:$0 sm:$0xff] }
 0x75e   :  { %v1331_v34 = vpack.c.bf16 %v1325_v24, %v1325_v24 }
 0x760   :  { %1365 = vmatmul.mubr.bf16.vlgmr.msra.gmra.mrb[44].mxu0 %v1331_v34  ;;  %1406 = vmatmul.mubr.bf16.vlgmr.msra.gmra.mrb[44].mxu1 %v1331_v34 }
 0x761   :  { %1680 = vmatpush3.bf16.msra.mxu0 %v1679_v37  ;;  %1675 = vmatprep.mubr.msk.f32.mxu0 %vm1980_vm3, %v1981_v11 }
 0x762   :  { %1681 = vmatprep.subr.bf16.mxu0 %v2699_v3 }
 0x765   :  { %1683 = vmatpush3.bf16.msra.mxu0 %v1682_v41 }
 0x766   :  { %1684 = vmatprep.subr.bf16.mxu0 %v2699_v3 }
 0x769   :  { %1686 = vmatpush3.bf16.msra.mxu0 %v1685_v0 }
 0x76a   :  { %1687 = vmatprep.subr.bf16.mxu0 %v2699_v3 }
 0x76d   :  { %1689 = vmatpush3.bf16.msra.mxu0 %v1688_v6 }
 0x76e   :  { %1690 = vmatprep.subr.bf16.mxu0 %v2699_v3 }
 0x771   :  { %1692 = vmatpush3.bf16.msra.mxu0 %v1691_v9 }
 0x772   :  { %1693 = vmatprep.subr.bf16.mxu0 %v2699_v3 }
 0x775   :  { %1695 = vmatpush3.bf16.msra.mxu0 %v1694_v17 }
 0x776   :  { %1696 = vmatprep.subr.bf16.mxu0 %v2699_v3 }
 0x779   :  { %1698 = vmatpush3.bf16.msra.mxu0 %v1697_v56 }
 0x77a   :  { %1699 = vmatprep.subr.bf16.mxu0 %v2699_v3 }
 0x77d   :  { %1701 = vmatpush3.bf16.msra.mxu0 %v1700_v16 }
 0x833   :  { %v1366_v48 = vpop.f32.mrb[44].mxu0  ;;  %v1407_v19 = vpop.f32.mrb[44].mxu1 }
 0x834   :  { %v1414_v30 = vadd.f32 %v1366_v48, %v2704_v14  ;;  %v1416_v60 = vadd.f32 %v1407_v19, %v2705_v39  ;;  %v1368_v57 = vpop.f32.mrb[45].mxu0  ;;  %v1409_v5 = vpop.f32.mrb[45].mxu1 }
 0x835   :  { %v1415_v59 = vadd.f32 %v1368_v57, %v2706_v13  ;;  %v1417_v15 = vadd.f32 %v1409_v5, %v2707_v20  ;;  %v1370_v21 = vpop.f32.mrb[46].mxu0  ;;  %v1411_v62 = vpop.f32.mrb[46].mxu1 }
 0x836   :  { %v1622_v25 = vmul.f32 -1.442695, %v1414_v30  ;;  %v1371_v26 = vpop.f32.mrb[47].mxu0  ;;  %v1412_v27 = vpop.f32.mrb[47].mxu1 }
 0x837   :  { %v1623_v28 = vmul.f32 -1.442695, %v1415_v59  ;;  %v1624_v3 = vmul.f32 -1.442695, %v1417_v15 }
 0x838   :  { %1877 = vpow2.f32 %v1622_v25 }
 0x839   :  { %1879 = vpow2.f32 %v1623_v28 }
 0x83a   :  { %1881 = vpow2.f32 %v1624_v3 }
 0x83b   :  { %1883 = vtanh.f32 %v1416_v60 }
 0x842   :  { %v1878_v42 = vpop.eup %1877 }
 0x843   :  { %v1880_v43 = vpop.eup %1879  ;;  %v1421_v44 = vadd.f32 1.0, %v1878_v42 }
 0x844   :  { %v1427_v45 = vadd.f32 1.0, %v1880_v43  ;;  %v1882_v46 = vpop.eup %1881 }
 0x845   :  { %1885 = vrcp.f32 %v1421_v44  ;;  %v1884_v47 = vpop.eup %1883  ;;  %v1434_v51 = vadd.f32 1.0, %v1882_v46 }
 0x846   :  { %1887 = vrcp.f32 %v1427_v45 }
 0x847   :  { %1889 = vrcp.f32 %v1434_v51 }
 0x84f   :  { %v1886_v49 = vpop.eup %1885 }
 0x850   :  { %v1888_v50 = vpop.eup %1887  ;;  %v1438_v52 = vmul.f32 %v1886_v49, %v1884_v47 }
 0x851   :  { %v1437_v29 = vmul.f32 %v1888_v50, %v2575_v55  ;;  %v1890_v31 = vpop.eup %1889 }
 0x853   :  { %v1439_v53 = vadd.f32 %v1438_v52, %v1437_v29 }
 0x855   :  { %1891 = vtanh.f32 %v1439_v53 }
 0x85f   :  { %v1892_v54 = vpop.eup %1891 }
 0x860   :  { %v1441_v32 = vmul.f32 %v1892_v54, %v1890_v31 }
 0x862   :  { %1676 = vmatmul.mubr.f32.vlgmr.msra.gmra.mrb[48].mxu0 %v1441_v32 }
 0x935   :  { %v1536_v23 = vpop.f32.mrb[48].mxu0 }
 0x936   :  { %v1537_v24 = vadd.f32 %v1625_v33, %v1536_v23  ;;  %v1677_v34 = vpop.f32.mrb[49].mxu0 }
 0x938   :  { %1541 = vst.msk [vmem:[#allocation8] sm:$0xff] %vm1540_vm4, %v1537_v24 }
 0x939   :  { %1958 = shalt.err (!%p1955_p12)
}
 0x93a   :  { %s1959_s29 = scalar_lea.hbm %s2659_s6, 128 }
 0x93b   :  { %p1960_p13 = scmp.ne.s32.totalorder %s2659_s6, %s1959_s29  ;;  %p1963_p0 = scmp.lt.u32.totalorder %s1959_s29, %s2659_s6 }
 0x93d   :  { %p1965_p1 = pnand %p1963_p0, %p1960_p13 }
 0x93f   :  { %1968 = shalt.err (!%p1965_p1)
}
 0x940   :  { %1551 = dma.vmem_to_hbm [thread:$0]  %s1549_s25, 128, %s2659_s6, [#allocation7]  }
 0x941   :  { %1971 = dma.done.wait [#allocation7], 128  }
 0x942   :  { %1972 = vsyncadd [#allocation7], 4294967168 }
 0x943   :  { %1555 = vsyncpa [#allocation6], 1 }
 0x944   :  { %1556 = vsyncpa [#allocation7], 1 }

</bundles_post_ra>
